<compile_context>
chip_gen: v7x
topology: tpu7x:2x2x1
jax: 0.10.0
libtpu: 0.0.40
codegen_flags: <defaults>
</compile_context>

<pallas_src>
import jax
import jax.numpy as jnp
from jax.experimental import pallas as pl
from jax.experimental.pallas import tpu as pltpu


_MIB = 1024 * 1024
_CANDIDATE_WIDTHS = (8192, 4096, 2048, 1024, 512, 256, 128)
# Below ~1 default tile of data the fixed pallas_call / dispatch overhead
# dominates and a standalone custom call only blocks XLA fusion.
_SMALL_BYPASS_BYTES = 2 * _MIB


def _relu_kernel(x_ref, o_ref):
    # One VPU vmax per vreg on the current VMEM tile; purely HBM-bound.
    o_ref[...] = jnp.maximum(x_ref[...], jnp.zeros((), dtype=x_ref.dtype))


def _round_up(a: int, m: int) -> int:
    return -(-a // m) * m


def _sublane_multiple(dtype) -> int:
    # Native sublane packing: 8 rows for 32-bit, 16 for 16-bit, 32 for 8-bit.
    return max(8, 32 // jnp.dtype(dtype).itemsize)


def _device_kind() -> str:
    try:
        return (jax.devices()[0].device_kind or "").lower()
    except Exception:
        return ""


def _is_v7x() -> bool:
    kind = _device_kind()
    return ("v7" in kind) or ("tpu7" in kind)


def _tensorcores_per_device() -> int:
    """Best-effort TensorCore count per device (1 on v5e/v6e, 2 on megacore/v7x)."""
    try:
        info = pltpu.get_tpu_info()
        for attr in ("num_cores", "core_count", "num_tensorcores",
                     "tensorcore_count", "cores_per_chip"):
            v = getattr(info, attr, None)
            if isinstance(v, int) and v >= 1:
                return min(v, 2)  # per-device TC count is at most 2 today
    except Exception:
        pass
    kind = _device_kind()
    if any(tag in kind for tag in ("v4", "v5p", "v5 p", "v7", "tpu7")):
        return 2
    return 1


def _choose_width(n: int, sub: int):
    # Widest lane dimension that divides n while still forming full
    # (sub, 128) vreg tiles (>= sub rows): unmasked stores, no padding.
    for w in _CANDIDATE_WIDTHS:
        if n % w == 0 and n // w >= sub:
            return w
    # Fallback (only reachable for small n): prefer the *narrowest* divisor,
    # i.e. the one with the most rows, so each vreg packs as many sublanes as
    # possible and fewer partial (masked) stores are emitted.
    for w in reversed(_CANDIDATE_WIDTHS):
        if n % w == 0:
            return w
    return None


def _pallas_relu_2d(x2d: jax.Array, *, tile_bytes: int | None = None,
                    in_place: bool = False) -> jax.Array:
    """Elementwise ReLU over an (R, W) array, W a multiple of 128."""
    R, W = x2d.shape
    dtype = x2d.dtype
    itemsize = jnp.dtype(dtype).itemsize
    sub = _sublane_multiple(dtype)
    ncores = _tensorcores_per_device()

    if tile_bytes is None:
        # ~2 MiB per operand; ~4 MiB on v7x where per-step overhead is a
        # bigger fraction of the faster per-TC HBM stream.
        tile_bytes = 4 * _MIB if _is_v7x() else 2 * _MIB

    if R <= sub:
        rows = R  # single full-extent block along rows
    else:
        rows = max(sub, (tile_bytes // (W * itemsize)) // sub * sub)
        if ncores > 1:
            # Megacore-style chips: aim for >= 4 balanced steps per core so
            # both TensorCores get work and the partial edge block does not
            # load-imbalance them.  Single-TC chips (v5e/v6e) skip this and
            # keep the full tile / minimal grid.
            # TODO(synk): verify with an xprof trace that
            # dimension_semantics=("parallel",) really shards this 1-D grid
            # across both TCs on v7x; if not, switch to an explicit
            # pltpu.CORE_PARALLEL leading axis.
            min_steps = 4 * ncores
            rows = min(rows, max(sub, _round_up(pl.cdiv(R, min_steps), sub)))
    grid = (pl.cdiv(R, rows),)  # partial edge block is masked by Pallas

    # in + out, double buffered.  Only set an explicit limit when the working
    # set would crowd the 16 MiB v5e scoped-VMEM default; stays well below
    # the 64 MiB physical VMEM of v7x.
    working_set = 2 * 2 * rows * W * itemsize
    vmem_limit = None
    if working_set > 12 * _MIB:
        vmem_limit = min(working_set + 8 * _MIB, 48 * _MIB)

    cost = pl.CostEstimate(
        flops=R * W,
        transcendentals=0,
        bytes_accessed=2 * R * W * itemsize,
    )

    return pl.pallas_call(
        _relu_kernel,
        out_shape=jax.ShapeDtypeStruct((R, W), dtype),
        grid_spec=pltpu.PrefetchScalarGridSpec(
            num_scalar_prefetch=0,
            grid=grid,
            # Default double buffering is enough: no VLIW slot is close to
            # saturation, so deeper pl.Buffered pipelining would only spend
            # VMEM that is better used on larger row tiles.
            in_specs=[pl.BlockSpec((rows, W), lambda i: (i, 0))],
            out_specs=pl.BlockSpec((rows, W), lambda i: (i, 0)),
        ),
        compiler_params=pltpu.CompilerParams(
            dimension_semantics=("parallel",),
            vmem_limit_bytes=vmem_limit,
        ),
        cost_estimate=cost,
        # In-place ReLU only pays off when the caller donates x; otherwise
        # XLA inserts a defensive copy, so aliasing stays opt-in.
        input_output_aliases={0: 0} if in_place else {},
    )(x2d)


def naive_augmented_relu_forward(x: jax.Array, p: float,
                                 *, in_place: bool = False) -> jax.Array:
    """Forward pass of NaiveAugmentedReLULayer.

    `p` only affects the custom backward in the PyTorch module; the forward
    output is elementwise ReLU of x with the same shape and dtype.
    """
    del p  # no effect on forward semantics
    n = int(x.size)
    if n == 0:
        return x
    dtype = x.dtype
    itemsize = jnp.dtype(dtype).itemsize

    # Small-tensor bypass: skip the custom call so XLA can fuse the ReLU into
    # its producer/consumer; the fixed kernel/dispatch overhead would
    # otherwise dominate entirely.
    if n * itemsize < _SMALL_BYPASS_BYTES:
        return jnp.maximum(x, jnp.zeros((), dtype=dtype))

    sub = _sublane_multiple(dtype)
    w = _choose_width(n, sub)
    if w is None:
        # Large ragged case (element count not a multiple of 128).  A single
        # fused XLA elementwise pass already runs at the 2N-byte HBM
        # roofline; any pad/slice or prefix+tail stitching around a Pallas
        # call would add a full extra read+write of the tensor, so we
        # deliberately do not go through the custom call here.
        return jnp.maximum(x, jnp.zeros((), dtype=dtype))

    # Common case: free reshape into a lane-dense 2D view, no padding copies.
    y2d = _pallas_relu_2d(x.reshape(n // w, w), in_place=in_place)
    return y2d.reshape(x.shape)


class NaiveAugmentedReLULayer:
    """JAX/Pallas equivalent of the PyTorch module (forward only)."""

    def __init__(self, p: float):
        self.p = p

    def __call__(self, x: jax.Array) -> jax.Array:
        return naive_augmented_relu_forward(x, self.p)
    # TODO(synk): the probability-p gradient augmentation lives only in the
    # custom autograd backward; training parity would need jax.custom_vjp
    # around this forward, not a change to the forward kernel.


if __name__ == "__main__":
    key = jax.random.PRNGKey(0)
    layer = NaiveAugmentedReLULayer(p=0.5)

    # 1) Spec-style small NCHW activation (8 KiB): takes the fused jnp bypass.
    x_small = jax.random.normal(key, (2, 4, 16, 16), dtype=jnp.float32)
    y_small = jax.block_until_ready(layer(x_small))
    assert y_small.shape == x_small.shape and y_small.dtype == x_small.dtype
    assert jnp.array_equal(y_small, jnp.maximum(x_small, 0.0)), "small mismatch"

    k1, k2, k3 = jax.random.split(key, 3)

    # 2) Larger f32 activation (~4.5 MiB): Pallas lane-dense path, grid with a
    #    partial sublane-edge block.
    x_large = jax.random.normal(k1, (36, 8, 64, 64), dtype=jnp.float32)
    y_large = jax.block_until_ready(layer(x_large))
    assert y_large.shape == x_large.shape and y_large.dtype == x_large.dtype
    assert jnp.array_equal(y_large, jnp.maximum(x_large, 0.0)), "large mismatch"

    # 3) bf16 activation (~4 MiB): Pallas path with 16-row sublane packing.
    x_bf16 = jax.random.normal(k2, (16, 32, 64, 64), dtype=jnp.bfloat16)
    y_bf16 = jax.block_until_ready(layer(x_bf16))
    assert y_bf16.dtype == x_bf16.dtype
    assert jnp.array_equal(y_bf16, jnp.maximum(x_bf16, 0)), "bf16 mismatch"

    # 4) Large ragged shape (element count not a multiple of 128): fused
    #    single-pass fallback (no pad/slice extra HBM traffic).
    x_rag = jax.random.normal(k3, (129, 129, 63), dtype=jnp.float32)
    y_rag = jax.block_until_ready(layer(x_rag))
    assert jnp.array_equal(y_rag, jnp.maximum(x_rag, 0.0)), "ragged mismatch"

    # 5) Tiny ragged bf16 shape from the original demo: bypass path.
    x_tiny = jax.random.normal(k2, (3, 5, 7), dtype=jnp.bfloat16)
    y_tiny = jax.block_until_ready(layer(x_tiny))
    assert jnp.array_equal(y_tiny, jnp.maximum(x_tiny, 0)), "tiny mismatch"

    print("KERNEL_OK")
</pallas_src>

<mosaic_0001>
module attributes {stable_mosaic.version = 11 : i64} {
  func.func @_relu_kernel(%arg0: i32, %arg1: memref<64x8192xf32, #tpu.memory_space<vmem>>, %arg2: memref<64x8192xf32, #tpu.memory_space<vmem>>) attributes {dimension_semantics = [#tpu.dimension_semantics<parallel>], iteration_bounds = array<i64: 3>, scalar_prefetch = 0 : i64, scratch_operands = 0 : i64, tpu.core_type = #tpu.core_type<tc>, window_params = [{transform_indices = @transform_0, window_bounds = array<i64: 64, 8192>}, {transform_indices = @transform_1, window_bounds = array<i64: 64, 8192>}]} {
    %c0 = arith.constant 0 : index
    %c0_0 = arith.constant 0 : index
    %0 = vector.load %arg1[%c0, %c0_0] : memref<64x8192xf32, #tpu.memory_space<vmem>>, vector<64x8192xf32>
    %cst = arith.constant 0.000000e+00 : f32
    %1 = vector.broadcast %cst : f32 to vector<64x8192xf32>
    %2 = arith.maximumf %0, %1 : vector<64x8192xf32>
    %c0_1 = arith.constant 0 : index
    %c0_2 = arith.constant 0 : index
    %3 = vector.load %arg2[%c0_1, %c0_2] : memref<64x8192xf32, #tpu.memory_space<vmem>>, vector<64x8192xf32>
    tpu.vector_store %arg2[%c0_1, %c0_2], %2 {strides = array<i32>} : memref<64x8192xf32, #tpu.memory_space<vmem>>, vector<64x8192xf32>,
    return
  }
  func.func @transform_0(%arg0: i32) -> (i32, i32) {
    %c0_i32 = arith.constant 0 : i32
    %c0_i32_0 = arith.constant 0 : i32
    return %arg0, %c0_i32 : i32, i32
  }
  func.func @transform_1(%arg0: i32) -> (i32, i32) {
    %c0_i32 = arith.constant 0 : i32
    %c0_i32_0 = arith.constant 0 : i32
    return %arg0, %c0_i32 : i32, i32
  }
}

</mosaic_0001>

<bundles_post_ra>
// kernel: tpu_custom_call.1
= control target key start
LH: loop header
LB: loop body
LE: loop exit
PB: predicated region body
PF: predicated region fallthrough
CT: control target
= control target key end

     0   :  { %6 = vsyncpa [#allocation3], 0  ;;  %s3169_s0 = inlined_call_operand.hbm [shape: f32[144,8192], index: 0, kind: input, shape index: {}]   ;;  %s3170_s1 = inlined_call_operand.hbm [shape: f32[144,8192], index: 1, kind: output, shape index: {}]  }
   0x1   :  { %8 = vsyncpa [#allocation3 + $0x1], 0 }
   0x2   :  { %9 = vsyncpa [#allocation4], 0 }
   0x3   :  { %11 = vsyncpa [#allocation4 + $0x1], 0  ;;  %s1973_s6 = smov 0   ;;  %s1975_s7 = smov 0  }
   0x4   :  { %s1977_s8 = smov 0   ;;  %s1979_s9 = smov 0  }
   0x5 LB: > { %s1994_s10 = sadd.s32 4294967295, %s1955_s9   ;;  %s1786_s11 = sadd.s32 4294967294, %s1955_s9   ;;  %s1955_s9 = sphi %s1979_s9, %s3178_s9   ;;  %s1951_s8 = sphi %s1977_s8, %s3177_s8   ;;  %s1947_s7 = sphi %s1975_s7, %s3176_s7   ;;  %s1943_s6 = sphi %s1973_s6, %s3175_s6  }
   0x6   : > { %s1998_s12 = sadd.s32 1, %s1955_s9   ;;  %s24_s13 = sadd.s32 1, %s1951_s8 }
   0x7   : > { %s21_s14 = ssub.s32 %s1955_s9, %s1998_s12  ;;  %p31_p0 = scmp.ne.s32.totalorder %s1951_s8, %s1947_s7 }
   0x8   : > { %p22_p1 = scmp.eq.s32.totalorder %s21_s14, 0  ;;  %p32_p2 = scmp.eq.s32.totalorder %s1955_s9, 0 }
   0x9   : > { %p37_p3 = scmp.ne.s32.totalorder %s1947_s7, %s1943_s6  ;;  %p38_p4 = scmp.eq.s32.totalorder %s1994_s10, 0 }
   0xa   : > { %s2010_s15 = scalar_select %p22_p1, %s1951_s8, %s24_s13  }
   0xb   : > { %p33_p5 = por %p32_p2, %p31_p0  ;;  %p2012_p6 = por %p38_p4, %p37_p3 }
   0xc   : > { %p61_p7 = scmp.eq.s32.totalorder %s1994_s10, 2  ;;  %p67_p8 = scmp.eq.s32.totalorder %s1786_s11, 2 }
   0xd   : > { %p1788_p11 = scmp.ge.s32.totalorder %s1955_s9, 3 }
   0xe   : > { %p2017_p9 = por %p61_p7, %p31_p0  ;;  %p2021_p10 = por %p67_p8, %p37_p3 }
   0xf   : > { %83 = sbr.rel (%p1788_p11) target bundleno = 57 (0x39), region = 16 }
  0x10   : > { %s3173_s18 = scalar_select %p2021_p10, 1, 0 }
  0x16   : > { %86 = sbr.rel (!%p33_p5) target bundleno = 57 (0x39), region = 20  ;;  %s87_s19 = sand.u32 (%p33_p5), 1, %s1951_s8  }
  0x17   : > { %s1790_s20 = sshll.u32 (%p33_p5), %s1955_s9, 3  ;;  %s1789_s21 = sshll.u32 (%p33_p5), %s87_s19, 12 }
  0x18   : > { %s93_s22 = ssub.s32 (%p33_p5), 18, %s1790_s20  ;;  %s2031_s25 = scalar_lea.sflag (%p33_p5), [#allocation3], %s87_s19 }
  0x19   : > { %p94_p12 = scmp.lt.s32.totalorder (%p33_p5), %s93_s22, 8  ;;  %s91_s26 = scalar_lea.vmem (%p33_p5), [#allocation2], %s1789_s21 }
  0x1d   : > { %s3180_s22 = smov (!%p94_p12, %s93_s22), 8 }
  0x1e   : > { %s2028_s23 = sshll.u32 %s3180_s22, 13 }
  0x1f   : > { %s99_s24 = ssub.s32 65536, %s2028_s23 }
  0x20   : > { %100 = vsyncadd %s2031_s25, %s99_s24  ;;  %p1793_p13 = scmp.ne.s32.totalorder %s2028_s23, 0  ;;  %s1814_s27 = sshll.u32 %s1955_s9, 16 }
  0x21   : > { %s2039_s30 = scalar_lea.hbm %s3169_s0, %s1814_s27  ;;  %s106_s2 = sshll.u32 %s91_s26, 4  ;;  %s2041_s2 = int_to_ptr.vmem [resolvable:$true] %s106_s2 }
  0x22   : > { %s1861_s3 = scalar_lea.hbm %s2039_s30, %s2028_s23  ;;  %s1865_s11 = scalar_lea.hbm %s3169_s0, 147456 }
  0x23   : > { %p1862_p0 = scmp.ne.s32.totalorder %s2039_s30, %s1861_s3  ;;  %p1866_p3 = scmp.lt.u32.totalorder %s2039_s30, %s3169_s0 }
  0x24   : > { %p1867_p4 = scmp.lt.u32.totalorder %s1865_s11, %s1861_s3  ;;  %p1869_p7 = scmp.lt.u32.totalorder %s1861_s3, %s2039_s30 }
  0x25   : > { %p1863_p1 = pnand %p1862_p0, %p1793_p13 }
  0x26   : > { %p1868_p5 = por %p1867_p4, %p1866_p3 }
  0x27   : > { %p1864_p2 = pneg %p1863_p1 }
  0x28   : > { %p1870_p8 = por %p1869_p7, %p1868_p5 }
  0x2a   : > { %p1871_p11 = pnand %p1870_p8, %p1864_p2 }
  0x2c   : > { %1874 = shalt.err (!%p1871_p11)
}
  0x2d   : > { %s1875_s19 = scalar_lea.vmem %s2041_s2, %s2028_s23  ;;  %s1957_s20 = smov [#allocation2]  }
  0x2e   : > { %p1876_p12 = scmp.ne.s32.totalorder %s2041_s2, %s1875_s19  ;;  %s1879_s21 = sshll.u32 %s1957_s20, 4  ;;  %s1880_s21 = int_to_ptr.vmem [resolvable:$false] %s1879_s21 }
  0x2f   : > { %s1881_s22 = scalar_lea.vmem %s1880_s21, 131072  ;;  %p1882_p10 = scmp.lt.s32.totalorder %s2041_s2, %s1880_s21 }
  0x30   : > { %p1877_p0 = pnand %p1876_p12, %p1793_p13  ;;  %p1883_p3 = scmp.lt.s32.totalorder %s1881_s22, %s1875_s19 }
  0x32   : > { %p1878_p1 = pneg %p1877_p0  ;;  %p1884_p4 = por %p1883_p3, %p1882_p10 }
  0x34   : > { %p1885_p5 = pnand %p1884_p4, %p1878_p1 }
  0x36   : > { %1888 = shalt.err (!%p1885_p5)
}
  0x37   : > { %s1958_s24 = smov 8192   ;;  %s1959_s26 = smov 512  }
  0x38   : > { %112 = dma.hbm_to_vmem [thread:$0]  (%p1793_p13), %s2039_s30, %s2028_s23, %s2041_s2, %s2031_s25, %s1958_s24, %s1958_s24, %s1959_s26  }
  0x39 PF: > { %p1798_p2 = scmp.ge.s32.totalorder %s1955_s9, 1  ;;  %p114_p7 = scmp.lt.s32.totalorder %s1955_s9, 4 }
  0x3b   : > { %p115_p8 = pnand %p1798_p2, %p114_p7 }
  0x3c   : > { %s2071_s27 = sand.u32 (!%p115_p8), 1, %s1947_s7  }
  0x3d   : > { %118 = sbr.rel (%p115_p8) target bundleno = 359 (0x167), region = 24  ;;  %s1799_s28 = sshll.u32 (!%p115_p8), %s2071_s27, 12 }
  0x3e   : > { %s121_s29 = scalar_lea.sflag (!%p115_p8), [#allocation3], %s2071_s27  ;;  %s2075_s3 = scalar_lea.vmem (!%p115_p8), [#allocation2], %s1799_s28 }
  0x44   : > { %1934 = dma.done.wait (%p2012_p6), %s121_s29, 65536  }
  0x45   : > { %1936 = vsyncadd (%p2012_p6), %s121_s29, 4294901760  ;;  %v155_v0 = vld [vmem:[%s2075_s3] sm:$0xff]  ;;  %v156_v1 = vld [vmem:[%s2075_s3 + $0x8] sm:$0xff]  ;;  %s2090_s16 = scalar_lea.vmem [#allocation5], %s1799_s28  ;;  %s1692_s23 = scalar_lea.sflag [#allocation4], %s2071_s27 }
  0x46   : > { %v157_v2 = vld [vmem:[%s2075_s3 + $0x10] sm:$0xff]  ;;  %v667_v3 = vmax.f32 %v155_v0, 0.0  ;;  %v668_v4 = vmax.f32 %v156_v1, 0.0  ;;  %v158_v6 = vld [vmem:[%s2075_s3 + $0x18] sm:$0xff]  ;;  %v159_v7 = vld [vmem:[%s2075_s3 + $0x20] sm:$0xff]  ;;  %s1802_s25 = sshll.u32 (%p2017_p9), %s1994_s10, 3 }
  0x47   : > { %v669_v5 = vmax.f32 %v157_v2, 0.0  ;;  %v160_v8 = vld [vmem:[%s2075_s3 + $0x28] sm:$0xff]  ;;  %v670_v9 = vmax.f32 %v158_v6, 0.0  ;;  %v671_v10 = vmax.f32 %v159_v7, 0.0  ;;  %v161_v12 = vld [vmem:[%s2075_s3 + $0x30] sm:$0xff]  ;;  %v162_v13 = vld [vmem:[%s2075_s3 + $0x38] sm:$0xff] }
  0x48   : > { %v672_v11 = vmax.f32 %v160_v8, 0.0  ;;  %v163_v14 = vld [vmem:[%s2075_s3 + $0x40] sm:$0xff]  ;;  %1179 = vst [vmem:[%s2090_s16] sm:$0xff] %v667_v3  ;;  %1180 = vst [vmem:[%s2090_s16 + $0x8] sm:$0xff] %v668_v4  ;;  %v673_v15 = vmax.f32 %v161_v12, 0.0  ;;  %v674_v16 = vmax.f32 %v162_v13, 0.0  ;;  %v164_v18 = vld [vmem:[%s2075_s3 + $0x48] sm:$0xff] }
  0x49   : > { %1181 = vst [vmem:[%s2090_s16 + $0x10] sm:$0xff] %v669_v5  ;;  %v675_v17 = vmax.f32 %v163_v14, 0.0  ;;  %v165_v19 = vld [vmem:[%s2075_s3 + $0x50] sm:$0xff]  ;;  %v166_v20 = vld [vmem:[%s2075_s3 + $0x58] sm:$0xff]  ;;  %1182 = vst [vmem:[%s2090_s16 + $0x18] sm:$0xff] %v670_v9  ;;  %v676_v21 = vmax.f32 %v164_v18, 0.0 }
  0x4a   : > { %1183 = vst [vmem:[%s2090_s16 + $0x20] sm:$0xff] %v671_v10  ;;  %1184 = vst [vmem:[%s2090_s16 + $0x28] sm:$0xff] %v672_v11  ;;  %v677_v22 = vmax.f32 %v165_v19, 0.0  ;;  %v678_v23 = vmax.f32 %v166_v20, 0.0  ;;  %v167_v24 = vld [vmem:[%s2075_s3 + $0x60] sm:$0xff]  ;;  %v168_v25 = vld [vmem:[%s2075_s3 + $0x68] sm:$0xff] }
  0x4b   : > { %v169_v26 = vld [vmem:[%s2075_s3 + $0x70] sm:$0xff]  ;;  %1185 = vst [vmem:[%s2090_s16 + $0x30] sm:$0xff] %v673_v15  ;;  %1186 = vst [vmem:[%s2090_s16 + $0x38] sm:$0xff] %v674_v16  ;;  %v679_v27 = vmax.f32 %v167_v24, 0.0  ;;  %v680_v28 = vmax.f32 %v168_v25, 0.0  ;;  %v170_v30 = vld [vmem:[%s2075_s3 + $0x78] sm:$0xff] }
  0x4c   : > { %1187 = vst [vmem:[%s2090_s16 + $0x40] sm:$0xff] %v675_v17  ;;  %v681_v29 = vmax.f32 %v169_v26, 0.0  ;;  %v171_v31 = vld [vmem:[%s2075_s3 + $0x80] sm:$0xff]  ;;  %v172_v32 = vld [vmem:[%s2075_s3 + $0x88] sm:$0xff]  ;;  %1188 = vst [vmem:[%s2090_s16 + $0x48] sm:$0xff] %v676_v21  ;;  %v682_v33 = vmax.f32 %v170_v30, 0.0 }
  0x4d   : > { %1189 = vst [vmem:[%s2090_s16 + $0x50] sm:$0xff] %v677_v22  ;;  %1190 = vst [vmem:[%s2090_s16 + $0x58] sm:$0xff] %v678_v23  ;;  %v683_v34 = vmax.f32 %v171_v31, 0.0  ;;  %v684_v35 = vmax.f32 %v172_v32, 0.0  ;;  %v173_v36 = vld [vmem:[%s2075_s3 + $0x90] sm:$0xff]  ;;  %v174_v37 = vld [vmem:[%s2075_s3 + $0x98] sm:$0xff] }
  0x4e   : > { %v175_v38 = vld [vmem:[%s2075_s3 + $0xa0] sm:$0xff]  ;;  %1191 = vst [vmem:[%s2090_s16 + $0x60] sm:$0xff] %v679_v27  ;;  %1192 = vst [vmem:[%s2090_s16 + $0x68] sm:$0xff] %v680_v28  ;;  %v685_v39 = vmax.f32 %v173_v36, 0.0  ;;  %v686_v40 = vmax.f32 %v174_v37, 0.0  ;;  %v176_v42 = vld [vmem:[%s2075_s3 + $0xa8] sm:$0xff] }
  0x4f   : > { %1193 = vst [vmem:[%s2090_s16 + $0x70] sm:$0xff] %v681_v29  ;;  %v687_v41 = vmax.f32 %v175_v38, 0.0  ;;  %v177_v43 = vld [vmem:[%s2075_s3 + $0xb0] sm:$0xff]  ;;  %v178_v44 = vld [vmem:[%s2075_s3 + $0xb8] sm:$0xff]  ;;  %1194 = vst [vmem:[%s2090_s16 + $0x78] sm:$0xff] %v682_v33  ;;  %v688_v45 = vmax.f32 %v176_v42, 0.0 }
  0x50   : > { %1195 = vst [vmem:[%s2090_s16 + $0x80] sm:$0xff] %v683_v34  ;;  %1196 = vst [vmem:[%s2090_s16 + $0x88] sm:$0xff] %v684_v35  ;;  %v689_v46 = vmax.f32 %v177_v43, 0.0  ;;  %v690_v47 = vmax.f32 %v178_v44, 0.0  ;;  %v179_v48 = vld [vmem:[%s2075_s3 + $0xc0] sm:$0xff]  ;;  %v180_v49 = vld [vmem:[%s2075_s3 + $0xc8] sm:$0xff] }
  0x51   : > { %v181_v50 = vld [vmem:[%s2075_s3 + $0xd0] sm:$0xff]  ;;  %1197 = vst [vmem:[%s2090_s16 + $0x90] sm:$0xff] %v685_v39  ;;  %1198 = vst [vmem:[%s2090_s16 + $0x98] sm:$0xff] %v686_v40  ;;  %v691_v51 = vmax.f32 %v179_v48, 0.0  ;;  %v692_v52 = vmax.f32 %v180_v49, 0.0  ;;  %v182_v54 = vld [vmem:[%s2075_s3 + $0xd8] sm:$0xff] }
  0x52   : > { %1199 = vst [vmem:[%s2090_s16 + $0xa0] sm:$0xff] %v687_v41  ;;  %v693_v53 = vmax.f32 %v181_v50, 0.0  ;;  %v183_v55 = vld [vmem:[%s2075_s3 + $0xe0] sm:$0xff]  ;;  %v184_v56 = vld [vmem:[%s2075_s3 + $0xe8] sm:$0xff]  ;;  %1200 = vst [vmem:[%s2090_s16 + $0xa8] sm:$0xff] %v688_v45  ;;  %v694_v57 = vmax.f32 %v182_v54, 0.0 }
  0x53   : > { %1201 = vst [vmem:[%s2090_s16 + $0xb0] sm:$0xff] %v689_v46  ;;  %1202 = vst [vmem:[%s2090_s16 + $0xb8] sm:$0xff] %v690_v47  ;;  %v695_v58 = vmax.f32 %v183_v55, 0.0  ;;  %v696_v59 = vmax.f32 %v184_v56, 0.0  ;;  %v185_v60 = vld [vmem:[%s2075_s3 + $0xf0] sm:$0xff]  ;;  %v186_v61 = vld [vmem:[%s2075_s3 + $0xf8] sm:$0xff] }
  0x54   : > { %v187_v62 = vld [vmem:[%s2075_s3 + $0x100] sm:$0xff]  ;;  %1203 = vst [vmem:[%s2090_s16 + $0xc0] sm:$0xff] %v691_v51  ;;  %1204 = vst [vmem:[%s2090_s16 + $0xc8] sm:$0xff] %v692_v52  ;;  %v697_v63 = vmax.f32 %v185_v60, 0.0  ;;  %v698_v0 = vmax.f32 %v186_v61, 0.0  ;;  %v188_v2 = vld [vmem:[%s2075_s3 + $0x108] sm:$0xff] }
  0x55   : > { %1205 = vst [vmem:[%s2090_s16 + $0xd0] sm:$0xff] %v693_v53  ;;  %v699_v1 = vmax.f32 %v187_v62, 0.0  ;;  %v189_v3 = vld [vmem:[%s2075_s3 + $0x110] sm:$0xff]  ;;  %v190_v4 = vld [vmem:[%s2075_s3 + $0x118] sm:$0xff]  ;;  %1206 = vst [vmem:[%s2090_s16 + $0xd8] sm:$0xff] %v694_v57  ;;  %v700_v5 = vmax.f32 %v188_v2, 0.0 }
  0x56   : > { %1207 = vst [vmem:[%s2090_s16 + $0xe0] sm:$0xff] %v695_v58  ;;  %1208 = vst [vmem:[%s2090_s16 + $0xe8] sm:$0xff] %v696_v59  ;;  %v701_v6 = vmax.f32 %v189_v3, 0.0  ;;  %v702_v7 = vmax.f32 %v190_v4, 0.0  ;;  %v191_v8 = vld [vmem:[%s2075_s3 + $0x120] sm:$0xff]  ;;  %v192_v9 = vld [vmem:[%s2075_s3 + $0x128] sm:$0xff] }
  0x57   : > { %v193_v10 = vld [vmem:[%s2075_s3 + $0x130] sm:$0xff]  ;;  %1209 = vst [vmem:[%s2090_s16 + $0xf0] sm:$0xff] %v697_v63  ;;  %1210 = vst [vmem:[%s2090_s16 + $0xf8] sm:$0xff] %v698_v0  ;;  %v703_v11 = vmax.f32 %v191_v8, 0.0  ;;  %v704_v12 = vmax.f32 %v192_v9, 0.0  ;;  %v194_v14 = vld [vmem:[%s2075_s3 + $0x138] sm:$0xff] }
  0x58   : > { %1211 = vst [vmem:[%s2090_s16 + $0x100] sm:$0xff] %v699_v1  ;;  %v705_v13 = vmax.f32 %v193_v10, 0.0  ;;  %v195_v15 = vld [vmem:[%s2075_s3 + $0x140] sm:$0xff]  ;;  %v196_v16 = vld [vmem:[%s2075_s3 + $0x148] sm:$0xff]  ;;  %1212 = vst [vmem:[%s2090_s16 + $0x108] sm:$0xff] %v700_v5  ;;  %v706_v17 = vmax.f32 %v194_v14, 0.0 }
  0x59   : > { %1213 = vst [vmem:[%s2090_s16 + $0x110] sm:$0xff] %v701_v6  ;;  %1214 = vst [vmem:[%s2090_s16 + $0x118] sm:$0xff] %v702_v7  ;;  %v707_v18 = vmax.f32 %v195_v15, 0.0  ;;  %v708_v19 = vmax.f32 %v196_v16, 0.0  ;;  %v197_v20 = vld [vmem:[%s2075_s3 + $0x150] sm:$0xff]  ;;  %v198_v21 = vld [vmem:[%s2075_s3 + $0x158] sm:$0xff] }
  0x5a   : > { %v199_v22 = vld [vmem:[%s2075_s3 + $0x160] sm:$0xff]  ;;  %1215 = vst [vmem:[%s2090_s16 + $0x120] sm:$0xff] %v703_v11  ;;  %1216 = vst [vmem:[%s2090_s16 + $0x128] sm:$0xff] %v704_v12  ;;  %v709_v23 = vmax.f32 %v197_v20, 0.0  ;;  %v710_v24 = vmax.f32 %v198_v21, 0.0  ;;  %v200_v26 = vld [vmem:[%s2075_s3 + $0x168] sm:$0xff] }
  0x5b   : > { %1217 = vst [vmem:[%s2090_s16 + $0x130] sm:$0xff] %v705_v13  ;;  %v711_v25 = vmax.f32 %v199_v22, 0.0  ;;  %v201_v27 = vld [vmem:[%s2075_s3 + $0x170] sm:$0xff]  ;;  %v202_v28 = vld [vmem:[%s2075_s3 + $0x178] sm:$0xff]  ;;  %1218 = vst [vmem:[%s2090_s16 + $0x138] sm:$0xff] %v706_v17  ;;  %v712_v29 = vmax.f32 %v200_v26, 0.0 }
  0x5c   : > { %1219 = vst [vmem:[%s2090_s16 + $0x140] sm:$0xff] %v707_v18  ;;  %1220 = vst [vmem:[%s2090_s16 + $0x148] sm:$0xff] %v708_v19  ;;  %v713_v30 = vmax.f32 %v201_v27, 0.0  ;;  %v714_v31 = vmax.f32 %v202_v28, 0.0  ;;  %v203_v32 = vld [vmem:[%s2075_s3 + $0x180] sm:$0xff]  ;;  %v204_v33 = vld [vmem:[%s2075_s3 + $0x188] sm:$0xff] }
  0x5d   : > { %v205_v34 = vld [vmem:[%s2075_s3 + $0x190] sm:$0xff]  ;;  %1221 = vst [vmem:[%s2090_s16 + $0x150] sm:$0xff] %v709_v23  ;;  %1222 = vst [vmem:[%s2090_s16 + $0x158] sm:$0xff] %v710_v24  ;;  %v715_v35 = vmax.f32 %v203_v32, 0.0  ;;  %v716_v36 = vmax.f32 %v204_v33, 0.0  ;;  %v206_v38 = vld [vmem:[%s2075_s3 + $0x198] sm:$0xff] }
  0x5e   : > { %1223 = vst [vmem:[%s2090_s16 + $0x160] sm:$0xff] %v711_v25  ;;  %v717_v37 = vmax.f32 %v205_v34, 0.0  ;;  %v207_v39 = vld [vmem:[%s2075_s3 + $0x1a0] sm:$0xff]  ;;  %v208_v40 = vld [vmem:[%s2075_s3 + $0x1a8] sm:$0xff]  ;;  %1224 = vst [vmem:[%s2090_s16 + $0x168] sm:$0xff] %v712_v29  ;;  %v718_v41 = vmax.f32 %v206_v38, 0.0 }
  0x5f   : > { %1225 = vst [vmem:[%s2090_s16 + $0x170] sm:$0xff] %v713_v30  ;;  %1226 = vst [vmem:[%s2090_s16 + $0x178] sm:$0xff] %v714_v31  ;;  %v719_v42 = vmax.f32 %v207_v39, 0.0  ;;  %v720_v43 = vmax.f32 %v208_v40, 0.0  ;;  %v209_v44 = vld [vmem:[%s2075_s3 + $0x1b0] sm:$0xff]  ;;  %v210_v45 = vld [vmem:[%s2075_s3 + $0x1b8] sm:$0xff] }
  0x60   : > { %v211_v46 = vld [vmem:[%s2075_s3 + $0x1c0] sm:$0xff]  ;;  %1227 = vst [vmem:[%s2090_s16 + $0x180] sm:$0xff] %v715_v35  ;;  %1228 = vst [vmem:[%s2090_s16 + $0x188] sm:$0xff] %v716_v36  ;;  %v721_v47 = vmax.f32 %v209_v44, 0.0  ;;  %v722_v48 = vmax.f32 %v210_v45, 0.0  ;;  %v212_v50 = vld [vmem:[%s2075_s3 + $0x1c8] sm:$0xff] }
  0x61   : > { %1229 = vst [vmem:[%s2090_s16 + $0x190] sm:$0xff] %v717_v37  ;;  %v723_v49 = vmax.f32 %v211_v46, 0.0  ;;  %v213_v51 = vld [vmem:[%s2075_s3 + $0x1d0] sm:$0xff]  ;;  %v214_v52 = vld [vmem:[%s2075_s3 + $0x1d8] sm:$0xff]  ;;  %1230 = vst [vmem:[%s2090_s16 + $0x198] sm:$0xff] %v718_v41  ;;  %v724_v53 = vmax.f32 %v212_v50, 0.0 }
  0x62   : > { %1231 = vst [vmem:[%s2090_s16 + $0x1a0] sm:$0xff] %v719_v42  ;;  %1232 = vst [vmem:[%s2090_s16 + $0x1a8] sm:$0xff] %v720_v43  ;;  %v725_v54 = vmax.f32 %v213_v51, 0.0  ;;  %v726_v55 = vmax.f32 %v214_v52, 0.0  ;;  %v215_v56 = vld [vmem:[%s2075_s3 + $0x1e0] sm:$0xff]  ;;  %v216_v57 = vld [vmem:[%s2075_s3 + $0x1e8] sm:$0xff] }
  0x63   : > { %v217_v58 = vld [vmem:[%s2075_s3 + $0x1f0] sm:$0xff]  ;;  %1233 = vst [vmem:[%s2090_s16 + $0x1b0] sm:$0xff] %v721_v47  ;;  %1234 = vst [vmem:[%s2090_s16 + $0x1b8] sm:$0xff] %v722_v48  ;;  %v727_v59 = vmax.f32 %v215_v56, 0.0  ;;  %v728_v60 = vmax.f32 %v216_v57, 0.0  ;;  %v218_v62 = vld [vmem:[%s2075_s3 + $0x1f8] sm:$0xff] }
  0x64   : > { %1235 = vst [vmem:[%s2090_s16 + $0x1c0] sm:$0xff] %v723_v49  ;;  %v729_v61 = vmax.f32 %v217_v58, 0.0  ;;  %v219_v63 = vld [vmem:[%s2075_s3 + $0x200] sm:$0xff]  ;;  %v220_v0 = vld [vmem:[%s2075_s3 + $0x208] sm:$0xff]  ;;  %1236 = vst [vmem:[%s2090_s16 + $0x1c8] sm:$0xff] %v724_v53  ;;  %v730_v1 = vmax.f32 %v218_v62, 0.0 }
  0x65   : > { %1237 = vst [vmem:[%s2090_s16 + $0x1d0] sm:$0xff] %v725_v54  ;;  %1238 = vst [vmem:[%s2090_s16 + $0x1d8] sm:$0xff] %v726_v55  ;;  %v731_v2 = vmax.f32 %v219_v63, 0.0  ;;  %v732_v3 = vmax.f32 %v220_v0, 0.0  ;;  %v221_v4 = vld [vmem:[%s2075_s3 + $0x210] sm:$0xff]  ;;  %v222_v5 = vld [vmem:[%s2075_s3 + $0x218] sm:$0xff] }
  0x66   : > { %v223_v6 = vld [vmem:[%s2075_s3 + $0x220] sm:$0xff]  ;;  %1239 = vst [vmem:[%s2090_s16 + $0x1e0] sm:$0xff] %v727_v59  ;;  %1240 = vst [vmem:[%s2090_s16 + $0x1e8] sm:$0xff] %v728_v60  ;;  %v733_v7 = vmax.f32 %v221_v4, 0.0  ;;  %v734_v8 = vmax.f32 %v222_v5, 0.0  ;;  %v224_v10 = vld [vmem:[%s2075_s3 + $0x228] sm:$0xff] }
  0x67   : > { %1241 = vst [vmem:[%s2090_s16 + $0x1f0] sm:$0xff] %v729_v61  ;;  %v735_v9 = vmax.f32 %v223_v6, 0.0  ;;  %v225_v11 = vld [vmem:[%s2075_s3 + $0x230] sm:$0xff]  ;;  %v226_v12 = vld [vmem:[%s2075_s3 + $0x238] sm:$0xff]  ;;  %1242 = vst [vmem:[%s2090_s16 + $0x1f8] sm:$0xff] %v730_v1  ;;  %v736_v13 = vmax.f32 %v224_v10, 0.0 }
  0x68   : > { %1243 = vst [vmem:[%s2090_s16 + $0x200] sm:$0xff] %v731_v2  ;;  %1244 = vst [vmem:[%s2090_s16 + $0x208] sm:$0xff] %v732_v3  ;;  %v737_v14 = vmax.f32 %v225_v11, 0.0  ;;  %v738_v15 = vmax.f32 %v226_v12, 0.0  ;;  %v227_v16 = vld [vmem:[%s2075_s3 + $0x240] sm:$0xff]  ;;  %v228_v17 = vld [vmem:[%s2075_s3 + $0x248] sm:$0xff] }
  0x69   : > { %v229_v18 = vld [vmem:[%s2075_s3 + $0x250] sm:$0xff]  ;;  %1245 = vst [vmem:[%s2090_s16 + $0x210] sm:$0xff] %v733_v7  ;;  %1246 = vst [vmem:[%s2090_s16 + $0x218] sm:$0xff] %v734_v8  ;;  %v739_v19 = vmax.f32 %v227_v16, 0.0  ;;  %v740_v20 = vmax.f32 %v228_v17, 0.0  ;;  %v230_v22 = vld [vmem:[%s2075_s3 + $0x258] sm:$0xff] }
  0x6a   : > { %1247 = vst [vmem:[%s2090_s16 + $0x220] sm:$0xff] %v735_v9  ;;  %v741_v21 = vmax.f32 %v229_v18, 0.0  ;;  %v231_v23 = vld [vmem:[%s2075_s3 + $0x260] sm:$0xff]  ;;  %v232_v24 = vld [vmem:[%s2075_s3 + $0x268] sm:$0xff]  ;;  %1248 = vst [vmem:[%s2090_s16 + $0x228] sm:$0xff] %v736_v13  ;;  %v742_v25 = vmax.f32 %v230_v22, 0.0 }
  0x6b   : > { %1249 = vst [vmem:[%s2090_s16 + $0x230] sm:$0xff] %v737_v14  ;;  %1250 = vst [vmem:[%s2090_s16 + $0x238] sm:$0xff] %v738_v15  ;;  %v743_v26 = vmax.f32 %v231_v23, 0.0  ;;  %v744_v27 = vmax.f32 %v232_v24, 0.0  ;;  %v233_v28 = vld [vmem:[%s2075_s3 + $0x270] sm:$0xff]  ;;  %v234_v29 = vld [vmem:[%s2075_s3 + $0x278] sm:$0xff] }
  0x6c   : > { %v235_v30 = vld [vmem:[%s2075_s3 + $0x280] sm:$0xff]  ;;  %1251 = vst [vmem:[%s2090_s16 + $0x240] sm:$0xff] %v739_v19  ;;  %1252 = vst [vmem:[%s2090_s16 + $0x248] sm:$0xff] %v740_v20  ;;  %v745_v31 = vmax.f32 %v233_v28, 0.0  ;;  %v746_v32 = vmax.f32 %v234_v29, 0.0  ;;  %v236_v34 = vld [vmem:[%s2075_s3 + $0x288] sm:$0xff] }
  0x6d   : > { %1253 = vst [vmem:[%s2090_s16 + $0x250] sm:$0xff] %v741_v21  ;;  %v747_v33 = vmax.f32 %v235_v30, 0.0  ;;  %v237_v35 = vld [vmem:[%s2075_s3 + $0x290] sm:$0xff]  ;;  %v238_v36 = vld [vmem:[%s2075_s3 + $0x298] sm:$0xff]  ;;  %1254 = vst [vmem:[%s2090_s16 + $0x258] sm:$0xff] %v742_v25  ;;  %v748_v37 = vmax.f32 %v236_v34, 0.0 }
  0x6e   : > { %1255 = vst [vmem:[%s2090_s16 + $0x260] sm:$0xff] %v743_v26  ;;  %1256 = vst [vmem:[%s2090_s16 + $0x268] sm:$0xff] %v744_v27  ;;  %v749_v38 = vmax.f32 %v237_v35, 0.0  ;;  %v750_v39 = vmax.f32 %v238_v36, 0.0  ;;  %v239_v40 = vld [vmem:[%s2075_s3 + $0x2a0] sm:$0xff]  ;;  %v240_v41 = vld [vmem:[%s2075_s3 + $0x2a8] sm:$0xff] }
  0x6f   : > { %v241_v42 = vld [vmem:[%s2075_s3 + $0x2b0] sm:$0xff]  ;;  %1257 = vst [vmem:[%s2090_s16 + $0x270] sm:$0xff] %v745_v31  ;;  %1258 = vst [vmem:[%s2090_s16 + $0x278] sm:$0xff] %v746_v32  ;;  %v751_v43 = vmax.f32 %v239_v40, 0.0  ;;  %v752_v44 = vmax.f32 %v240_v41, 0.0  ;;  %v242_v46 = vld [vmem:[%s2075_s3 + $0x2b8] sm:$0xff] }
  0x70   : > { %1259 = vst [vmem:[%s2090_s16 + $0x280] sm:$0xff] %v747_v33  ;;  %v753_v45 = vmax.f32 %v241_v42, 0.0  ;;  %v243_v47 = vld [vmem:[%s2075_s3 + $0x2c0] sm:$0xff]  ;;  %v244_v48 = vld [vmem:[%s2075_s3 + $0x2c8] sm:$0xff]  ;;  %1260 = vst [vmem:[%s2090_s16 + $0x288] sm:$0xff] %v748_v37  ;;  %v754_v49 = vmax.f32 %v242_v46, 0.0 }
  0x71   : > { %1261 = vst [vmem:[%s2090_s16 + $0x290] sm:$0xff] %v749_v38  ;;  %1262 = vst [vmem:[%s2090_s16 + $0x298] sm:$0xff] %v750_v39  ;;  %v755_v50 = vmax.f32 %v243_v47, 0.0  ;;  %v756_v51 = vmax.f32 %v244_v48, 0.0  ;;  %v245_v52 = vld [vmem:[%s2075_s3 + $0x2d0] sm:$0xff]  ;;  %v246_v53 = vld [vmem:[%s2075_s3 + $0x2d8] sm:$0xff] }
  0x72   : > { %v247_v54 = vld [vmem:[%s2075_s3 + $0x2e0] sm:$0xff]  ;;  %1263 = vst [vmem:[%s2090_s16 + $0x2a0] sm:$0xff] %v751_v43  ;;  %1264 = vst [vmem:[%s2090_s16 + $0x2a8] sm:$0xff] %v752_v44  ;;  %v757_v55 = vmax.f32 %v245_v52, 0.0  ;;  %v758_v56 = vmax.f32 %v246_v53, 0.0  ;;  %v248_v58 = vld [vmem:[%s2075_s3 + $0x2e8] sm:$0xff] }
  0x73   : > { %1265 = vst [vmem:[%s2090_s16 + $0x2b0] sm:$0xff] %v753_v45  ;;  %v759_v57 = vmax.f32 %v247_v54, 0.0  ;;  %v249_v59 = vld [vmem:[%s2075_s3 + $0x2f0] sm:$0xff]  ;;  %v250_v60 = vld [vmem:[%s2075_s3 + $0x2f8] sm:$0xff]  ;;  %1266 = vst [vmem:[%s2090_s16 + $0x2b8] sm:$0xff] %v754_v49  ;;  %v760_v61 = vmax.f32 %v248_v58, 0.0 }
  0x74   : > { %1267 = vst [vmem:[%s2090_s16 + $0x2c0] sm:$0xff] %v755_v50  ;;  %1268 = vst [vmem:[%s2090_s16 + $0x2c8] sm:$0xff] %v756_v51  ;;  %v761_v62 = vmax.f32 %v249_v59, 0.0  ;;  %v762_v63 = vmax.f32 %v250_v60, 0.0  ;;  %v251_v0 = vld [vmem:[%s2075_s3 + $0x300] sm:$0xff]  ;;  %v252_v1 = vld [vmem:[%s2075_s3 + $0x308] sm:$0xff] }
  0x75   : > { %v253_v2 = vld [vmem:[%s2075_s3 + $0x310] sm:$0xff]  ;;  %1269 = vst [vmem:[%s2090_s16 + $0x2d0] sm:$0xff] %v757_v55  ;;  %1270 = vst [vmem:[%s2090_s16 + $0x2d8] sm:$0xff] %v758_v56  ;;  %v763_v3 = vmax.f32 %v251_v0, 0.0  ;;  %v764_v4 = vmax.f32 %v252_v1, 0.0  ;;  %v254_v6 = vld [vmem:[%s2075_s3 + $0x318] sm:$0xff] }
  0x76   : > { %1271 = vst [vmem:[%s2090_s16 + $0x2e0] sm:$0xff] %v759_v57  ;;  %v765_v5 = vmax.f32 %v253_v2, 0.0  ;;  %v255_v7 = vld [vmem:[%s2075_s3 + $0x320] sm:$0xff]  ;;  %v256_v8 = vld [vmem:[%s2075_s3 + $0x328] sm:$0xff]  ;;  %1272 = vst [vmem:[%s2090_s16 + $0x2e8] sm:$0xff] %v760_v61  ;;  %v766_v9 = vmax.f32 %v254_v6, 0.0 }
  0x77   : > { %1273 = vst [vmem:[%s2090_s16 + $0x2f0] sm:$0xff] %v761_v62  ;;  %1274 = vst [vmem:[%s2090_s16 + $0x2f8] sm:$0xff] %v762_v63  ;;  %v767_v10 = vmax.f32 %v255_v7, 0.0  ;;  %v768_v11 = vmax.f32 %v256_v8, 0.0  ;;  %v257_v12 = vld [vmem:[%s2075_s3 + $0x330] sm:$0xff]  ;;  %v258_v13 = vld [vmem:[%s2075_s3 + $0x338] sm:$0xff] }
  0x78   : > { %v259_v14 = vld [vmem:[%s2075_s3 + $0x340] sm:$0xff]  ;;  %1275 = vst [vmem:[%s2090_s16 + $0x300] sm:$0xff] %v763_v3  ;;  %1276 = vst [vmem:[%s2090_s16 + $0x308] sm:$0xff] %v764_v4  ;;  %v769_v15 = vmax.f32 %v257_v12, 0.0  ;;  %v770_v16 = vmax.f32 %v258_v13, 0.0  ;;  %v260_v18 = vld [vmem:[%s2075_s3 + $0x348] sm:$0xff] }
  0x79   : > { %1277 = vst [vmem:[%s2090_s16 + $0x310] sm:$0xff] %v765_v5  ;;  %v771_v17 = vmax.f32 %v259_v14, 0.0  ;;  %v261_v19 = vld [vmem:[%s2075_s3 + $0x350] sm:$0xff]  ;;  %v262_v20 = vld [vmem:[%s2075_s3 + $0x358] sm:$0xff]  ;;  %1278 = vst [vmem:[%s2090_s16 + $0x318] sm:$0xff] %v766_v9  ;;  %v772_v21 = vmax.f32 %v260_v18, 0.0 }
  0x7a   : > { %1279 = vst [vmem:[%s2090_s16 + $0x320] sm:$0xff] %v767_v10  ;;  %1280 = vst [vmem:[%s2090_s16 + $0x328] sm:$0xff] %v768_v11  ;;  %v773_v22 = vmax.f32 %v261_v19, 0.0  ;;  %v774_v23 = vmax.f32 %v262_v20, 0.0  ;;  %v263_v24 = vld [vmem:[%s2075_s3 + $0x360] sm:$0xff]  ;;  %v264_v25 = vld [vmem:[%s2075_s3 + $0x368] sm:$0xff] }
  0x7b   : > { %v265_v26 = vld [vmem:[%s2075_s3 + $0x370] sm:$0xff]  ;;  %1281 = vst [vmem:[%s2090_s16 + $0x330] sm:$0xff] %v769_v15  ;;  %1282 = vst [vmem:[%s2090_s16 + $0x338] sm:$0xff] %v770_v16  ;;  %v775_v27 = vmax.f32 %v263_v24, 0.0  ;;  %v776_v28 = vmax.f32 %v264_v25, 0.0  ;;  %v266_v30 = vld [vmem:[%s2075_s3 + $0x378] sm:$0xff] }
  0x7c   : > { %1283 = vst [vmem:[%s2090_s16 + $0x340] sm:$0xff] %v771_v17  ;;  %v777_v29 = vmax.f32 %v265_v26, 0.0  ;;  %v267_v31 = vld [vmem:[%s2075_s3 + $0x380] sm:$0xff]  ;;  %v268_v32 = vld [vmem:[%s2075_s3 + $0x388] sm:$0xff]  ;;  %1284 = vst [vmem:[%s2090_s16 + $0x348] sm:$0xff] %v772_v21  ;;  %v778_v33 = vmax.f32 %v266_v30, 0.0 }
  0x7d   : > { %1285 = vst [vmem:[%s2090_s16 + $0x350] sm:$0xff] %v773_v22  ;;  %1286 = vst [vmem:[%s2090_s16 + $0x358] sm:$0xff] %v774_v23  ;;  %v779_v34 = vmax.f32 %v267_v31, 0.0  ;;  %v780_v35 = vmax.f32 %v268_v32, 0.0  ;;  %v269_v36 = vld [vmem:[%s2075_s3 + $0x390] sm:$0xff]  ;;  %v270_v37 = vld [vmem:[%s2075_s3 + $0x398] sm:$0xff] }
  0x7e   : > { %v271_v38 = vld [vmem:[%s2075_s3 + $0x3a0] sm:$0xff]  ;;  %1287 = vst [vmem:[%s2090_s16 + $0x360] sm:$0xff] %v775_v27  ;;  %1288 = vst [vmem:[%s2090_s16 + $0x368] sm:$0xff] %v776_v28  ;;  %v781_v39 = vmax.f32 %v269_v36, 0.0  ;;  %v782_v40 = vmax.f32 %v270_v37, 0.0  ;;  %v272_v42 = vld [vmem:[%s2075_s3 + $0x3a8] sm:$0xff] }
  0x7f   : > { %1289 = vst [vmem:[%s2090_s16 + $0x370] sm:$0xff] %v777_v29  ;;  %v783_v41 = vmax.f32 %v271_v38, 0.0  ;;  %v273_v43 = vld [vmem:[%s2075_s3 + $0x3b0] sm:$0xff]  ;;  %v274_v44 = vld [vmem:[%s2075_s3 + $0x3b8] sm:$0xff]  ;;  %1290 = vst [vmem:[%s2090_s16 + $0x378] sm:$0xff] %v778_v33  ;;  %v784_v45 = vmax.f32 %v272_v42, 0.0 }
  0x80   : > { %1291 = vst [vmem:[%s2090_s16 + $0x380] sm:$0xff] %v779_v34  ;;  %1292 = vst [vmem:[%s2090_s16 + $0x388] sm:$0xff] %v780_v35  ;;  %v785_v46 = vmax.f32 %v273_v43, 0.0  ;;  %v786_v47 = vmax.f32 %v274_v44, 0.0  ;;  %v275_v48 = vld [vmem:[%s2075_s3 + $0x3c0] sm:$0xff]  ;;  %v276_v49 = vld [vmem:[%s2075_s3 + $0x3c8] sm:$0xff] }
  0x81   : > { %v277_v50 = vld [vmem:[%s2075_s3 + $0x3d0] sm:$0xff]  ;;  %1293 = vst [vmem:[%s2090_s16 + $0x390] sm:$0xff] %v781_v39  ;;  %1294 = vst [vmem:[%s2090_s16 + $0x398] sm:$0xff] %v782_v40  ;;  %v787_v51 = vmax.f32 %v275_v48, 0.0  ;;  %v788_v52 = vmax.f32 %v276_v49, 0.0  ;;  %v278_v54 = vld [vmem:[%s2075_s3 + $0x3d8] sm:$0xff] }
  0x82   : > { %1295 = vst [vmem:[%s2090_s16 + $0x3a0] sm:$0xff] %v783_v41  ;;  %v789_v53 = vmax.f32 %v277_v50, 0.0  ;;  %v279_v55 = vld [vmem:[%s2075_s3 + $0x3e0] sm:$0xff]  ;;  %v280_v56 = vld [vmem:[%s2075_s3 + $0x3e8] sm:$0xff]  ;;  %1296 = vst [vmem:[%s2090_s16 + $0x3a8] sm:$0xff] %v784_v45  ;;  %v790_v57 = vmax.f32 %v278_v54, 0.0 }
  0x83   : > { %1297 = vst [vmem:[%s2090_s16 + $0x3b0] sm:$0xff] %v785_v46  ;;  %1298 = vst [vmem:[%s2090_s16 + $0x3b8] sm:$0xff] %v786_v47  ;;  %v791_v58 = vmax.f32 %v279_v55, 0.0  ;;  %v792_v59 = vmax.f32 %v280_v56, 0.0  ;;  %v281_v60 = vld [vmem:[%s2075_s3 + $0x3f0] sm:$0xff]  ;;  %v282_v61 = vld [vmem:[%s2075_s3 + $0x3f8] sm:$0xff] }
  0x84   : > { %v283_v62 = vld [vmem:[%s2075_s3 + $0x400] sm:$0xff]  ;;  %1299 = vst [vmem:[%s2090_s16 + $0x3c0] sm:$0xff] %v787_v51  ;;  %1300 = vst [vmem:[%s2090_s16 + $0x3c8] sm:$0xff] %v788_v52  ;;  %v793_v63 = vmax.f32 %v281_v60, 0.0  ;;  %v794_v0 = vmax.f32 %v282_v61, 0.0  ;;  %v284_v2 = vld [vmem:[%s2075_s3 + $0x408] sm:$0xff] }
  0x85   : > { %1301 = vst [vmem:[%s2090_s16 + $0x3d0] sm:$0xff] %v789_v53  ;;  %v795_v1 = vmax.f32 %v283_v62, 0.0  ;;  %v285_v3 = vld [vmem:[%s2075_s3 + $0x410] sm:$0xff]  ;;  %v286_v4 = vld [vmem:[%s2075_s3 + $0x418] sm:$0xff]  ;;  %1302 = vst [vmem:[%s2090_s16 + $0x3d8] sm:$0xff] %v790_v57  ;;  %v796_v5 = vmax.f32 %v284_v2, 0.0 }
  0x86   : > { %1303 = vst [vmem:[%s2090_s16 + $0x3e0] sm:$0xff] %v791_v58  ;;  %1304 = vst [vmem:[%s2090_s16 + $0x3e8] sm:$0xff] %v792_v59  ;;  %v797_v6 = vmax.f32 %v285_v3, 0.0  ;;  %v798_v7 = vmax.f32 %v286_v4, 0.0  ;;  %v287_v8 = vld [vmem:[%s2075_s3 + $0x420] sm:$0xff]  ;;  %v288_v9 = vld [vmem:[%s2075_s3 + $0x428] sm:$0xff] }
  0x87   : > { %v289_v10 = vld [vmem:[%s2075_s3 + $0x430] sm:$0xff]  ;;  %1305 = vst [vmem:[%s2090_s16 + $0x3f0] sm:$0xff] %v793_v63  ;;  %1306 = vst [vmem:[%s2090_s16 + $0x3f8] sm:$0xff] %v794_v0  ;;  %v799_v11 = vmax.f32 %v287_v8, 0.0  ;;  %v800_v12 = vmax.f32 %v288_v9, 0.0  ;;  %v290_v14 = vld [vmem:[%s2075_s3 + $0x438] sm:$0xff] }
  0x88   : > { %1307 = vst [vmem:[%s2090_s16 + $0x400] sm:$0xff] %v795_v1  ;;  %v801_v13 = vmax.f32 %v289_v10, 0.0  ;;  %v291_v15 = vld [vmem:[%s2075_s3 + $0x440] sm:$0xff]  ;;  %v292_v16 = vld [vmem:[%s2075_s3 + $0x448] sm:$0xff]  ;;  %1308 = vst [vmem:[%s2090_s16 + $0x408] sm:$0xff] %v796_v5  ;;  %v802_v17 = vmax.f32 %v290_v14, 0.0 }
  0x89   : > { %1309 = vst [vmem:[%s2090_s16 + $0x410] sm:$0xff] %v797_v6  ;;  %1310 = vst [vmem:[%s2090_s16 + $0x418] sm:$0xff] %v798_v7  ;;  %v803_v18 = vmax.f32 %v291_v15, 0.0  ;;  %v804_v19 = vmax.f32 %v292_v16, 0.0  ;;  %v293_v20 = vld [vmem:[%s2075_s3 + $0x450] sm:$0xff]  ;;  %v294_v21 = vld [vmem:[%s2075_s3 + $0x458] sm:$0xff] }
  0x8a   : > { %v295_v22 = vld [vmem:[%s2075_s3 + $0x460] sm:$0xff]  ;;  %1311 = vst [vmem:[%s2090_s16 + $0x420] sm:$0xff] %v799_v11  ;;  %1312 = vst [vmem:[%s2090_s16 + $0x428] sm:$0xff] %v800_v12  ;;  %v805_v23 = vmax.f32 %v293_v20, 0.0  ;;  %v806_v24 = vmax.f32 %v294_v21, 0.0  ;;  %v296_v26 = vld [vmem:[%s2075_s3 + $0x468] sm:$0xff] }
  0x8b   : > { %1313 = vst [vmem:[%s2090_s16 + $0x430] sm:$0xff] %v801_v13  ;;  %v807_v25 = vmax.f32 %v295_v22, 0.0  ;;  %v297_v27 = vld [vmem:[%s2075_s3 + $0x470] sm:$0xff]  ;;  %v298_v28 = vld [vmem:[%s2075_s3 + $0x478] sm:$0xff]  ;;  %1314 = vst [vmem:[%s2090_s16 + $0x438] sm:$0xff] %v802_v17  ;;  %v808_v29 = vmax.f32 %v296_v26, 0.0 }
  0x8c   : > { %1315 = vst [vmem:[%s2090_s16 + $0x440] sm:$0xff] %v803_v18  ;;  %1316 = vst [vmem:[%s2090_s16 + $0x448] sm:$0xff] %v804_v19  ;;  %v809_v30 = vmax.f32 %v297_v27, 0.0  ;;  %v810_v31 = vmax.f32 %v298_v28, 0.0  ;;  %v299_v32 = vld [vmem:[%s2075_s3 + $0x480] sm:$0xff]  ;;  %v300_v33 = vld [vmem:[%s2075_s3 + $0x488] sm:$0xff] }
  0x8d   : > { %v301_v34 = vld [vmem:[%s2075_s3 + $0x490] sm:$0xff]  ;;  %1317 = vst [vmem:[%s2090_s16 + $0x450] sm:$0xff] %v805_v23  ;;  %1318 = vst [vmem:[%s2090_s16 + $0x458] sm:$0xff] %v806_v24  ;;  %v811_v35 = vmax.f32 %v299_v32, 0.0  ;;  %v812_v36 = vmax.f32 %v300_v33, 0.0  ;;  %v302_v38 = vld [vmem:[%s2075_s3 + $0x498] sm:$0xff] }
  0x8e   : > { %1319 = vst [vmem:[%s2090_s16 + $0x460] sm:$0xff] %v807_v25  ;;  %v813_v37 = vmax.f32 %v301_v34, 0.0  ;;  %v303_v39 = vld [vmem:[%s2075_s3 + $0x4a0] sm:$0xff]  ;;  %v304_v40 = vld [vmem:[%s2075_s3 + $0x4a8] sm:$0xff]  ;;  %1320 = vst [vmem:[%s2090_s16 + $0x468] sm:$0xff] %v808_v29  ;;  %v814_v41 = vmax.f32 %v302_v38, 0.0 }
  0x8f   : > { %1321 = vst [vmem:[%s2090_s16 + $0x470] sm:$0xff] %v809_v30  ;;  %1322 = vst [vmem:[%s2090_s16 + $0x478] sm:$0xff] %v810_v31  ;;  %v815_v42 = vmax.f32 %v303_v39, 0.0  ;;  %v816_v43 = vmax.f32 %v304_v40, 0.0  ;;  %v305_v44 = vld [vmem:[%s2075_s3 + $0x4b0] sm:$0xff]  ;;  %v306_v45 = vld [vmem:[%s2075_s3 + $0x4b8] sm:$0xff] }
  0x90   : > { %v307_v46 = vld [vmem:[%s2075_s3 + $0x4c0] sm:$0xff]  ;;  %1323 = vst [vmem:[%s2090_s16 + $0x480] sm:$0xff] %v811_v35  ;;  %1324 = vst [vmem:[%s2090_s16 + $0x488] sm:$0xff] %v812_v36  ;;  %v817_v47 = vmax.f32 %v305_v44, 0.0  ;;  %v818_v48 = vmax.f32 %v306_v45, 0.0  ;;  %v308_v50 = vld [vmem:[%s2075_s3 + $0x4c8] sm:$0xff] }
  0x91   : > { %1325 = vst [vmem:[%s2090_s16 + $0x490] sm:$0xff] %v813_v37  ;;  %v819_v49 = vmax.f32 %v307_v46, 0.0  ;;  %v309_v51 = vld [vmem:[%s2075_s3 + $0x4d0] sm:$0xff]  ;;  %v310_v52 = vld [vmem:[%s2075_s3 + $0x4d8] sm:$0xff]  ;;  %1326 = vst [vmem:[%s2090_s16 + $0x498] sm:$0xff] %v814_v41  ;;  %v820_v53 = vmax.f32 %v308_v50, 0.0 }
  0x92   : > { %1327 = vst [vmem:[%s2090_s16 + $0x4a0] sm:$0xff] %v815_v42  ;;  %1328 = vst [vmem:[%s2090_s16 + $0x4a8] sm:$0xff] %v816_v43  ;;  %v821_v54 = vmax.f32 %v309_v51, 0.0  ;;  %v822_v55 = vmax.f32 %v310_v52, 0.0  ;;  %v311_v56 = vld [vmem:[%s2075_s3 + $0x4e0] sm:$0xff]  ;;  %v312_v57 = vld [vmem:[%s2075_s3 + $0x4e8] sm:$0xff] }
  0x93   : > { %v313_v58 = vld [vmem:[%s2075_s3 + $0x4f0] sm:$0xff]  ;;  %1329 = vst [vmem:[%s2090_s16 + $0x4b0] sm:$0xff] %v817_v47  ;;  %1330 = vst [vmem:[%s2090_s16 + $0x4b8] sm:$0xff] %v818_v48  ;;  %v823_v59 = vmax.f32 %v311_v56, 0.0  ;;  %v824_v60 = vmax.f32 %v312_v57, 0.0  ;;  %v314_v62 = vld [vmem:[%s2075_s3 + $0x4f8] sm:$0xff] }
  0x94   : > { %1331 = vst [vmem:[%s2090_s16 + $0x4c0] sm:$0xff] %v819_v49  ;;  %v825_v61 = vmax.f32 %v313_v58, 0.0  ;;  %v315_v63 = vld [vmem:[%s2075_s3 + $0x500] sm:$0xff]  ;;  %v316_v0 = vld [vmem:[%s2075_s3 + $0x508] sm:$0xff]  ;;  %1332 = vst [vmem:[%s2090_s16 + $0x4c8] sm:$0xff] %v820_v53  ;;  %v826_v1 = vmax.f32 %v314_v62, 0.0 }
  0x95   : > { %1333 = vst [vmem:[%s2090_s16 + $0x4d0] sm:$0xff] %v821_v54  ;;  %1334 = vst [vmem:[%s2090_s16 + $0x4d8] sm:$0xff] %v822_v55  ;;  %v827_v2 = vmax.f32 %v315_v63, 0.0  ;;  %v828_v3 = vmax.f32 %v316_v0, 0.0  ;;  %v317_v4 = vld [vmem:[%s2075_s3 + $0x510] sm:$0xff]  ;;  %v318_v5 = vld [vmem:[%s2075_s3 + $0x518] sm:$0xff] }
  0x96   : > { %v319_v6 = vld [vmem:[%s2075_s3 + $0x520] sm:$0xff]  ;;  %1335 = vst [vmem:[%s2090_s16 + $0x4e0] sm:$0xff] %v823_v59  ;;  %1336 = vst [vmem:[%s2090_s16 + $0x4e8] sm:$0xff] %v824_v60  ;;  %v829_v7 = vmax.f32 %v317_v4, 0.0  ;;  %v830_v8 = vmax.f32 %v318_v5, 0.0  ;;  %v320_v10 = vld [vmem:[%s2075_s3 + $0x528] sm:$0xff] }
  0x97   : > { %1337 = vst [vmem:[%s2090_s16 + $0x4f0] sm:$0xff] %v825_v61  ;;  %v831_v9 = vmax.f32 %v319_v6, 0.0  ;;  %v321_v11 = vld [vmem:[%s2075_s3 + $0x530] sm:$0xff]  ;;  %v322_v12 = vld [vmem:[%s2075_s3 + $0x538] sm:$0xff]  ;;  %1338 = vst [vmem:[%s2090_s16 + $0x4f8] sm:$0xff] %v826_v1  ;;  %v832_v13 = vmax.f32 %v320_v10, 0.0 }
  0x98   : > { %1339 = vst [vmem:[%s2090_s16 + $0x500] sm:$0xff] %v827_v2  ;;  %1340 = vst [vmem:[%s2090_s16 + $0x508] sm:$0xff] %v828_v3  ;;  %v833_v14 = vmax.f32 %v321_v11, 0.0  ;;  %v834_v15 = vmax.f32 %v322_v12, 0.0  ;;  %v323_v16 = vld [vmem:[%s2075_s3 + $0x540] sm:$0xff]  ;;  %v324_v17 = vld [vmem:[%s2075_s3 + $0x548] sm:$0xff] }
  0x99   : > { %v325_v18 = vld [vmem:[%s2075_s3 + $0x550] sm:$0xff]  ;;  %1341 = vst [vmem:[%s2090_s16 + $0x510] sm:$0xff] %v829_v7  ;;  %1342 = vst [vmem:[%s2090_s16 + $0x518] sm:$0xff] %v830_v8  ;;  %v835_v19 = vmax.f32 %v323_v16, 0.0  ;;  %v836_v20 = vmax.f32 %v324_v17, 0.0  ;;  %v326_v22 = vld [vmem:[%s2075_s3 + $0x558] sm:$0xff] }
  0x9a   : > { %1343 = vst [vmem:[%s2090_s16 + $0x520] sm:$0xff] %v831_v9  ;;  %v837_v21 = vmax.f32 %v325_v18, 0.0  ;;  %v327_v23 = vld [vmem:[%s2075_s3 + $0x560] sm:$0xff]  ;;  %v328_v24 = vld [vmem:[%s2075_s3 + $0x568] sm:$0xff]  ;;  %1344 = vst [vmem:[%s2090_s16 + $0x528] sm:$0xff] %v832_v13  ;;  %v838_v25 = vmax.f32 %v326_v22, 0.0 }
  0x9b   : > { %1345 = vst [vmem:[%s2090_s16 + $0x530] sm:$0xff] %v833_v14  ;;  %1346 = vst [vmem:[%s2090_s16 + $0x538] sm:$0xff] %v834_v15  ;;  %v839_v26 = vmax.f32 %v327_v23, 0.0  ;;  %v840_v27 = vmax.f32 %v328_v24, 0.0  ;;  %v329_v28 = vld [vmem:[%s2075_s3 + $0x570] sm:$0xff]  ;;  %v330_v29 = vld [vmem:[%s2075_s3 + $0x578] sm:$0xff] }
  0x9c   : > { %v331_v30 = vld [vmem:[%s2075_s3 + $0x580] sm:$0xff]  ;;  %1347 = vst [vmem:[%s2090_s16 + $0x540] sm:$0xff] %v835_v19  ;;  %1348 = vst [vmem:[%s2090_s16 + $0x548] sm:$0xff] %v836_v20  ;;  %v841_v31 = vmax.f32 %v329_v28, 0.0  ;;  %v842_v32 = vmax.f32 %v330_v29, 0.0  ;;  %v332_v34 = vld [vmem:[%s2075_s3 + $0x588] sm:$0xff] }
  0x9d   : > { %1349 = vst [vmem:[%s2090_s16 + $0x550] sm:$0xff] %v837_v21  ;;  %v843_v33 = vmax.f32 %v331_v30, 0.0  ;;  %v333_v35 = vld [vmem:[%s2075_s3 + $0x590] sm:$0xff]  ;;  %v334_v36 = vld [vmem:[%s2075_s3 + $0x598] sm:$0xff]  ;;  %1350 = vst [vmem:[%s2090_s16 + $0x558] sm:$0xff] %v838_v25  ;;  %v844_v37 = vmax.f32 %v332_v34, 0.0 }
  0x9e   : > { %1351 = vst [vmem:[%s2090_s16 + $0x560] sm:$0xff] %v839_v26  ;;  %1352 = vst [vmem:[%s2090_s16 + $0x568] sm:$0xff] %v840_v27  ;;  %v845_v38 = vmax.f32 %v333_v35, 0.0  ;;  %v846_v39 = vmax.f32 %v334_v36, 0.0  ;;  %v335_v40 = vld [vmem:[%s2075_s3 + $0x5a0] sm:$0xff]  ;;  %v336_v41 = vld [vmem:[%s2075_s3 + $0x5a8] sm:$0xff] }
  0x9f   : > { %v337_v42 = vld [vmem:[%s2075_s3 + $0x5b0] sm:$0xff]  ;;  %1353 = vst [vmem:[%s2090_s16 + $0x570] sm:$0xff] %v841_v31  ;;  %1354 = vst [vmem:[%s2090_s16 + $0x578] sm:$0xff] %v842_v32  ;;  %v847_v43 = vmax.f32 %v335_v40, 0.0  ;;  %v848_v44 = vmax.f32 %v336_v41, 0.0  ;;  %v338_v46 = vld [vmem:[%s2075_s3 + $0x5b8] sm:$0xff] }
  0xa0   : > { %1355 = vst [vmem:[%s2090_s16 + $0x580] sm:$0xff] %v843_v33  ;;  %v849_v45 = vmax.f32 %v337_v42, 0.0  ;;  %v339_v47 = vld [vmem:[%s2075_s3 + $0x5c0] sm:$0xff]  ;;  %v340_v48 = vld [vmem:[%s2075_s3 + $0x5c8] sm:$0xff]  ;;  %1356 = vst [vmem:[%s2090_s16 + $0x588] sm:$0xff] %v844_v37  ;;  %v850_v49 = vmax.f32 %v338_v46, 0.0 }
  0xa1   : > { %1357 = vst [vmem:[%s2090_s16 + $0x590] sm:$0xff] %v845_v38  ;;  %1358 = vst [vmem:[%s2090_s16 + $0x598] sm:$0xff] %v846_v39  ;;  %v851_v50 = vmax.f32 %v339_v47, 0.0  ;;  %v852_v51 = vmax.f32 %v340_v48, 0.0  ;;  %v341_v52 = vld [vmem:[%s2075_s3 + $0x5d0] sm:$0xff]  ;;  %v342_v53 = vld [vmem:[%s2075_s3 + $0x5d8] sm:$0xff] }
  0xa2   : > { %v343_v54 = vld [vmem:[%s2075_s3 + $0x5e0] sm:$0xff]  ;;  %1359 = vst [vmem:[%s2090_s16 + $0x5a0] sm:$0xff] %v847_v43  ;;  %1360 = vst [vmem:[%s2090_s16 + $0x5a8] sm:$0xff] %v848_v44  ;;  %v853_v55 = vmax.f32 %v341_v52, 0.0  ;;  %v854_v56 = vmax.f32 %v342_v53, 0.0  ;;  %v344_v58 = vld [vmem:[%s2075_s3 + $0x5e8] sm:$0xff] }
  0xa3   : > { %1361 = vst [vmem:[%s2090_s16 + $0x5b0] sm:$0xff] %v849_v45  ;;  %v855_v57 = vmax.f32 %v343_v54, 0.0  ;;  %v345_v59 = vld [vmem:[%s2075_s3 + $0x5f0] sm:$0xff]  ;;  %v346_v60 = vld [vmem:[%s2075_s3 + $0x5f8] sm:$0xff]  ;;  %1362 = vst [vmem:[%s2090_s16 + $0x5b8] sm:$0xff] %v850_v49  ;;  %v856_v61 = vmax.f32 %v344_v58, 0.0 }
  0xa4   : > { %1363 = vst [vmem:[%s2090_s16 + $0x5c0] sm:$0xff] %v851_v50  ;;  %1364 = vst [vmem:[%s2090_s16 + $0x5c8] sm:$0xff] %v852_v51  ;;  %v857_v62 = vmax.f32 %v345_v59, 0.0  ;;  %v858_v63 = vmax.f32 %v346_v60, 0.0  ;;  %v347_v0 = vld [vmem:[%s2075_s3 + $0x600] sm:$0xff]  ;;  %v348_v1 = vld [vmem:[%s2075_s3 + $0x608] sm:$0xff] }
  0xa5   : > { %v349_v2 = vld [vmem:[%s2075_s3 + $0x610] sm:$0xff]  ;;  %1365 = vst [vmem:[%s2090_s16 + $0x5d0] sm:$0xff] %v853_v55  ;;  %1366 = vst [vmem:[%s2090_s16 + $0x5d8] sm:$0xff] %v854_v56  ;;  %v859_v3 = vmax.f32 %v347_v0, 0.0  ;;  %v860_v4 = vmax.f32 %v348_v1, 0.0  ;;  %v350_v6 = vld [vmem:[%s2075_s3 + $0x618] sm:$0xff] }
  0xa6   : > { %1367 = vst [vmem:[%s2090_s16 + $0x5e0] sm:$0xff] %v855_v57  ;;  %v861_v5 = vmax.f32 %v349_v2, 0.0  ;;  %v351_v7 = vld [vmem:[%s2075_s3 + $0x620] sm:$0xff]  ;;  %v352_v8 = vld [vmem:[%s2075_s3 + $0x628] sm:$0xff]  ;;  %1368 = vst [vmem:[%s2090_s16 + $0x5e8] sm:$0xff] %v856_v61  ;;  %v862_v9 = vmax.f32 %v350_v6, 0.0 }
  0xa7   : > { %1369 = vst [vmem:[%s2090_s16 + $0x5f0] sm:$0xff] %v857_v62  ;;  %1370 = vst [vmem:[%s2090_s16 + $0x5f8] sm:$0xff] %v858_v63  ;;  %v863_v10 = vmax.f32 %v351_v7, 0.0  ;;  %v864_v11 = vmax.f32 %v352_v8, 0.0  ;;  %v353_v12 = vld [vmem:[%s2075_s3 + $0x630] sm:$0xff]  ;;  %v354_v13 = vld [vmem:[%s2075_s3 + $0x638] sm:$0xff] }
  0xa8   : > { %v355_v14 = vld [vmem:[%s2075_s3 + $0x640] sm:$0xff]  ;;  %1371 = vst [vmem:[%s2090_s16 + $0x600] sm:$0xff] %v859_v3  ;;  %1372 = vst [vmem:[%s2090_s16 + $0x608] sm:$0xff] %v860_v4  ;;  %v865_v15 = vmax.f32 %v353_v12, 0.0  ;;  %v866_v16 = vmax.f32 %v354_v13, 0.0  ;;  %v356_v18 = vld [vmem:[%s2075_s3 + $0x648] sm:$0xff] }
  0xa9   : > { %1373 = vst [vmem:[%s2090_s16 + $0x610] sm:$0xff] %v861_v5  ;;  %v867_v17 = vmax.f32 %v355_v14, 0.0  ;;  %v357_v19 = vld [vmem:[%s2075_s3 + $0x650] sm:$0xff]  ;;  %v358_v20 = vld [vmem:[%s2075_s3 + $0x658] sm:$0xff]  ;;  %1374 = vst [vmem:[%s2090_s16 + $0x618] sm:$0xff] %v862_v9  ;;  %v868_v21 = vmax.f32 %v356_v18, 0.0 }
  0xaa   : > { %1375 = vst [vmem:[%s2090_s16 + $0x620] sm:$0xff] %v863_v10  ;;  %1376 = vst [vmem:[%s2090_s16 + $0x628] sm:$0xff] %v864_v11  ;;  %v869_v22 = vmax.f32 %v357_v19, 0.0  ;;  %v870_v23 = vmax.f32 %v358_v20, 0.0  ;;  %v359_v24 = vld [vmem:[%s2075_s3 + $0x660] sm:$0xff]  ;;  %v360_v25 = vld [vmem:[%s2075_s3 + $0x668] sm:$0xff] }
  0xab   : > { %v361_v26 = vld [vmem:[%s2075_s3 + $0x670] sm:$0xff]  ;;  %1377 = vst [vmem:[%s2090_s16 + $0x630] sm:$0xff] %v865_v15  ;;  %1378 = vst [vmem:[%s2090_s16 + $0x638] sm:$0xff] %v866_v16  ;;  %v871_v27 = vmax.f32 %v359_v24, 0.0  ;;  %v872_v28 = vmax.f32 %v360_v25, 0.0  ;;  %v362_v30 = vld [vmem:[%s2075_s3 + $0x678] sm:$0xff] }
  0xac   : > { %1379 = vst [vmem:[%s2090_s16 + $0x640] sm:$0xff] %v867_v17  ;;  %v873_v29 = vmax.f32 %v361_v26, 0.0  ;;  %v363_v31 = vld [vmem:[%s2075_s3 + $0x680] sm:$0xff]  ;;  %v364_v32 = vld [vmem:[%s2075_s3 + $0x688] sm:$0xff]  ;;  %1380 = vst [vmem:[%s2090_s16 + $0x648] sm:$0xff] %v868_v21  ;;  %v874_v33 = vmax.f32 %v362_v30, 0.0 }
  0xad   : > { %1381 = vst [vmem:[%s2090_s16 + $0x650] sm:$0xff] %v869_v22  ;;  %1382 = vst [vmem:[%s2090_s16 + $0x658] sm:$0xff] %v870_v23  ;;  %v875_v34 = vmax.f32 %v363_v31, 0.0  ;;  %v876_v35 = vmax.f32 %v364_v32, 0.0  ;;  %v365_v36 = vld [vmem:[%s2075_s3 + $0x690] sm:$0xff]  ;;  %v366_v37 = vld [vmem:[%s2075_s3 + $0x698] sm:$0xff] }
  0xae   : > { %v367_v38 = vld [vmem:[%s2075_s3 + $0x6a0] sm:$0xff]  ;;  %1383 = vst [vmem:[%s2090_s16 + $0x660] sm:$0xff] %v871_v27  ;;  %1384 = vst [vmem:[%s2090_s16 + $0x668] sm:$0xff] %v872_v28  ;;  %v877_v39 = vmax.f32 %v365_v36, 0.0  ;;  %v878_v40 = vmax.f32 %v366_v37, 0.0  ;;  %v368_v42 = vld [vmem:[%s2075_s3 + $0x6a8] sm:$0xff] }
  0xaf   : > { %1385 = vst [vmem:[%s2090_s16 + $0x670] sm:$0xff] %v873_v29  ;;  %v879_v41 = vmax.f32 %v367_v38, 0.0  ;;  %v369_v43 = vld [vmem:[%s2075_s3 + $0x6b0] sm:$0xff]  ;;  %v370_v44 = vld [vmem:[%s2075_s3 + $0x6b8] sm:$0xff]  ;;  %1386 = vst [vmem:[%s2090_s16 + $0x678] sm:$0xff] %v874_v33  ;;  %v880_v45 = vmax.f32 %v368_v42, 0.0 }
  0xb0   : > { %1387 = vst [vmem:[%s2090_s16 + $0x680] sm:$0xff] %v875_v34  ;;  %1388 = vst [vmem:[%s2090_s16 + $0x688] sm:$0xff] %v876_v35  ;;  %v881_v46 = vmax.f32 %v369_v43, 0.0  ;;  %v882_v47 = vmax.f32 %v370_v44, 0.0  ;;  %v371_v48 = vld [vmem:[%s2075_s3 + $0x6c0] sm:$0xff]  ;;  %v372_v49 = vld [vmem:[%s2075_s3 + $0x6c8] sm:$0xff] }
  0xb1   : > { %v373_v50 = vld [vmem:[%s2075_s3 + $0x6d0] sm:$0xff]  ;;  %1389 = vst [vmem:[%s2090_s16 + $0x690] sm:$0xff] %v877_v39  ;;  %1390 = vst [vmem:[%s2090_s16 + $0x698] sm:$0xff] %v878_v40  ;;  %v883_v51 = vmax.f32 %v371_v48, 0.0  ;;  %v884_v52 = vmax.f32 %v372_v49, 0.0  ;;  %v374_v54 = vld [vmem:[%s2075_s3 + $0x6d8] sm:$0xff] }
  0xb2   : > { %1391 = vst [vmem:[%s2090_s16 + $0x6a0] sm:$0xff] %v879_v41  ;;  %v885_v53 = vmax.f32 %v373_v50, 0.0  ;;  %v375_v55 = vld [vmem:[%s2075_s3 + $0x6e0] sm:$0xff]  ;;  %v376_v56 = vld [vmem:[%s2075_s3 + $0x6e8] sm:$0xff]  ;;  %1392 = vst [vmem:[%s2090_s16 + $0x6a8] sm:$0xff] %v880_v45  ;;  %v886_v57 = vmax.f32 %v374_v54, 0.0 }
  0xb3   : > { %1393 = vst [vmem:[%s2090_s16 + $0x6b0] sm:$0xff] %v881_v46  ;;  %1394 = vst [vmem:[%s2090_s16 + $0x6b8] sm:$0xff] %v882_v47  ;;  %v887_v58 = vmax.f32 %v375_v55, 0.0  ;;  %v888_v59 = vmax.f32 %v376_v56, 0.0  ;;  %v377_v60 = vld [vmem:[%s2075_s3 + $0x6f0] sm:$0xff]  ;;  %v378_v61 = vld [vmem:[%s2075_s3 + $0x6f8] sm:$0xff] }
  0xb4   : > { %v379_v62 = vld [vmem:[%s2075_s3 + $0x700] sm:$0xff]  ;;  %1395 = vst [vmem:[%s2090_s16 + $0x6c0] sm:$0xff] %v883_v51  ;;  %1396 = vst [vmem:[%s2090_s16 + $0x6c8] sm:$0xff] %v884_v52  ;;  %v889_v63 = vmax.f32 %v377_v60, 0.0  ;;  %v890_v0 = vmax.f32 %v378_v61, 0.0  ;;  %v380_v2 = vld [vmem:[%s2075_s3 + $0x708] sm:$0xff] }
  0xb5   : > { %1397 = vst [vmem:[%s2090_s16 + $0x6d0] sm:$0xff] %v885_v53  ;;  %v891_v1 = vmax.f32 %v379_v62, 0.0  ;;  %v381_v3 = vld [vmem:[%s2075_s3 + $0x710] sm:$0xff]  ;;  %v382_v4 = vld [vmem:[%s2075_s3 + $0x718] sm:$0xff]  ;;  %1398 = vst [vmem:[%s2090_s16 + $0x6d8] sm:$0xff] %v886_v57  ;;  %v892_v5 = vmax.f32 %v380_v2, 0.0 }
  0xb6   : > { %1399 = vst [vmem:[%s2090_s16 + $0x6e0] sm:$0xff] %v887_v58  ;;  %1400 = vst [vmem:[%s2090_s16 + $0x6e8] sm:$0xff] %v888_v59  ;;  %v893_v6 = vmax.f32 %v381_v3, 0.0  ;;  %v894_v7 = vmax.f32 %v382_v4, 0.0  ;;  %v383_v8 = vld [vmem:[%s2075_s3 + $0x720] sm:$0xff]  ;;  %v384_v9 = vld [vmem:[%s2075_s3 + $0x728] sm:$0xff] }
  0xb7   : > { %v385_v10 = vld [vmem:[%s2075_s3 + $0x730] sm:$0xff]  ;;  %1401 = vst [vmem:[%s2090_s16 + $0x6f0] sm:$0xff] %v889_v63  ;;  %1402 = vst [vmem:[%s2090_s16 + $0x6f8] sm:$0xff] %v890_v0  ;;  %v895_v11 = vmax.f32 %v383_v8, 0.0  ;;  %v896_v12 = vmax.f32 %v384_v9, 0.0  ;;  %v386_v14 = vld [vmem:[%s2075_s3 + $0x738] sm:$0xff] }
  0xb8   : > { %1403 = vst [vmem:[%s2090_s16 + $0x700] sm:$0xff] %v891_v1  ;;  %v897_v13 = vmax.f32 %v385_v10, 0.0  ;;  %v387_v15 = vld [vmem:[%s2075_s3 + $0x740] sm:$0xff]  ;;  %v388_v16 = vld [vmem:[%s2075_s3 + $0x748] sm:$0xff]  ;;  %1404 = vst [vmem:[%s2090_s16 + $0x708] sm:$0xff] %v892_v5  ;;  %v898_v17 = vmax.f32 %v386_v14, 0.0 }
  0xb9   : > { %1405 = vst [vmem:[%s2090_s16 + $0x710] sm:$0xff] %v893_v6  ;;  %1406 = vst [vmem:[%s2090_s16 + $0x718] sm:$0xff] %v894_v7  ;;  %v899_v18 = vmax.f32 %v387_v15, 0.0  ;;  %v900_v19 = vmax.f32 %v388_v16, 0.0  ;;  %v389_v20 = vld [vmem:[%s2075_s3 + $0x750] sm:$0xff]  ;;  %v390_v21 = vld [vmem:[%s2075_s3 + $0x758] sm:$0xff] }
  0xba   : > { %v391_v22 = vld [vmem:[%s2075_s3 + $0x760] sm:$0xff]  ;;  %1407 = vst [vmem:[%s2090_s16 + $0x720] sm:$0xff] %v895_v11  ;;  %1408 = vst [vmem:[%s2090_s16 + $0x728] sm:$0xff] %v896_v12  ;;  %v901_v23 = vmax.f32 %v389_v20, 0.0  ;;  %v902_v24 = vmax.f32 %v390_v21, 0.0  ;;  %v392_v26 = vld [vmem:[%s2075_s3 + $0x768] sm:$0xff] }
  0xbb   : > { %1409 = vst [vmem:[%s2090_s16 + $0x730] sm:$0xff] %v897_v13  ;;  %v903_v25 = vmax.f32 %v391_v22, 0.0  ;;  %v393_v27 = vld [vmem:[%s2075_s3 + $0x770] sm:$0xff]  ;;  %v394_v28 = vld [vmem:[%s2075_s3 + $0x778] sm:$0xff]  ;;  %1410 = vst [vmem:[%s2090_s16 + $0x738] sm:$0xff] %v898_v17  ;;  %v904_v29 = vmax.f32 %v392_v26, 0.0 }
  0xbc   : > { %1411 = vst [vmem:[%s2090_s16 + $0x740] sm:$0xff] %v899_v18  ;;  %1412 = vst [vmem:[%s2090_s16 + $0x748] sm:$0xff] %v900_v19  ;;  %v905_v30 = vmax.f32 %v393_v27, 0.0  ;;  %v906_v31 = vmax.f32 %v394_v28, 0.0  ;;  %v395_v32 = vld [vmem:[%s2075_s3 + $0x780] sm:$0xff]  ;;  %v396_v33 = vld [vmem:[%s2075_s3 + $0x788] sm:$0xff] }
  0xbd   : > { %v397_v34 = vld [vmem:[%s2075_s3 + $0x790] sm:$0xff]  ;;  %1413 = vst [vmem:[%s2090_s16 + $0x750] sm:$0xff] %v901_v23  ;;  %1414 = vst [vmem:[%s2090_s16 + $0x758] sm:$0xff] %v902_v24  ;;  %v907_v35 = vmax.f32 %v395_v32, 0.0  ;;  %v908_v36 = vmax.f32 %v396_v33, 0.0  ;;  %v398_v38 = vld [vmem:[%s2075_s3 + $0x798] sm:$0xff] }
  0xbe   : > { %1415 = vst [vmem:[%s2090_s16 + $0x760] sm:$0xff] %v903_v25  ;;  %v909_v37 = vmax.f32 %v397_v34, 0.0  ;;  %v399_v39 = vld [vmem:[%s2075_s3 + $0x7a0] sm:$0xff]  ;;  %v400_v40 = vld [vmem:[%s2075_s3 + $0x7a8] sm:$0xff]  ;;  %1416 = vst [vmem:[%s2090_s16 + $0x768] sm:$0xff] %v904_v29  ;;  %v910_v41 = vmax.f32 %v398_v38, 0.0 }
  0xbf   : > { %1417 = vst [vmem:[%s2090_s16 + $0x770] sm:$0xff] %v905_v30  ;;  %1418 = vst [vmem:[%s2090_s16 + $0x778] sm:$0xff] %v906_v31  ;;  %v911_v42 = vmax.f32 %v399_v39, 0.0  ;;  %v912_v43 = vmax.f32 %v400_v40, 0.0  ;;  %v401_v44 = vld [vmem:[%s2075_s3 + $0x7b0] sm:$0xff]  ;;  %v402_v45 = vld [vmem:[%s2075_s3 + $0x7b8] sm:$0xff] }
  0xc0   : > { %v403_v46 = vld [vmem:[%s2075_s3 + $0x7c0] sm:$0xff]  ;;  %1419 = vst [vmem:[%s2090_s16 + $0x780] sm:$0xff] %v907_v35  ;;  %1420 = vst [vmem:[%s2090_s16 + $0x788] sm:$0xff] %v908_v36  ;;  %v913_v47 = vmax.f32 %v401_v44, 0.0  ;;  %v914_v48 = vmax.f32 %v402_v45, 0.0  ;;  %v404_v50 = vld [vmem:[%s2075_s3 + $0x7c8] sm:$0xff] }
  0xc1   : > { %1421 = vst [vmem:[%s2090_s16 + $0x790] sm:$0xff] %v909_v37  ;;  %v915_v49 = vmax.f32 %v403_v46, 0.0  ;;  %v405_v51 = vld [vmem:[%s2075_s3 + $0x7d0] sm:$0xff]  ;;  %v406_v52 = vld [vmem:[%s2075_s3 + $0x7d8] sm:$0xff]  ;;  %1422 = vst [vmem:[%s2090_s16 + $0x798] sm:$0xff] %v910_v41  ;;  %v916_v53 = vmax.f32 %v404_v50, 0.0 }
  0xc2   : > { %1423 = vst [vmem:[%s2090_s16 + $0x7a0] sm:$0xff] %v911_v42  ;;  %1424 = vst [vmem:[%s2090_s16 + $0x7a8] sm:$0xff] %v912_v43  ;;  %v917_v54 = vmax.f32 %v405_v51, 0.0  ;;  %v918_v55 = vmax.f32 %v406_v52, 0.0  ;;  %v407_v56 = vld [vmem:[%s2075_s3 + $0x7e0] sm:$0xff]  ;;  %v408_v57 = vld [vmem:[%s2075_s3 + $0x7e8] sm:$0xff] }
  0xc3   : > { %v409_v58 = vld [vmem:[%s2075_s3 + $0x7f0] sm:$0xff]  ;;  %1425 = vst [vmem:[%s2090_s16 + $0x7b0] sm:$0xff] %v913_v47  ;;  %1426 = vst [vmem:[%s2090_s16 + $0x7b8] sm:$0xff] %v914_v48  ;;  %v919_v59 = vmax.f32 %v407_v56, 0.0  ;;  %v920_v60 = vmax.f32 %v408_v57, 0.0  ;;  %v410_v62 = vld [vmem:[%s2075_s3 + $0x7f8] sm:$0xff] }
  0xc4   : > { %1427 = vst [vmem:[%s2090_s16 + $0x7c0] sm:$0xff] %v915_v49  ;;  %v921_v61 = vmax.f32 %v409_v58, 0.0  ;;  %v411_v63 = vld [vmem:[%s2075_s3 + $0x800] sm:$0xff]  ;;  %v412_v0 = vld [vmem:[%s2075_s3 + $0x808] sm:$0xff]  ;;  %1428 = vst [vmem:[%s2090_s16 + $0x7c8] sm:$0xff] %v916_v53  ;;  %v922_v1 = vmax.f32 %v410_v62, 0.0 }
  0xc5   : > { %1429 = vst [vmem:[%s2090_s16 + $0x7d0] sm:$0xff] %v917_v54  ;;  %1430 = vst [vmem:[%s2090_s16 + $0x7d8] sm:$0xff] %v918_v55  ;;  %v923_v2 = vmax.f32 %v411_v63, 0.0  ;;  %v924_v3 = vmax.f32 %v412_v0, 0.0  ;;  %v413_v4 = vld [vmem:[%s2075_s3 + $0x810] sm:$0xff]  ;;  %v414_v5 = vld [vmem:[%s2075_s3 + $0x818] sm:$0xff] }
  0xc6   : > { %v415_v6 = vld [vmem:[%s2075_s3 + $0x820] sm:$0xff]  ;;  %1431 = vst [vmem:[%s2090_s16 + $0x7e0] sm:$0xff] %v919_v59  ;;  %1432 = vst [vmem:[%s2090_s16 + $0x7e8] sm:$0xff] %v920_v60  ;;  %v925_v7 = vmax.f32 %v413_v4, 0.0  ;;  %v926_v8 = vmax.f32 %v414_v5, 0.0  ;;  %v416_v10 = vld [vmem:[%s2075_s3 + $0x828] sm:$0xff] }
  0xc7   : > { %1433 = vst [vmem:[%s2090_s16 + $0x7f0] sm:$0xff] %v921_v61  ;;  %v927_v9 = vmax.f32 %v415_v6, 0.0  ;;  %v417_v11 = vld [vmem:[%s2075_s3 + $0x830] sm:$0xff]  ;;  %v418_v12 = vld [vmem:[%s2075_s3 + $0x838] sm:$0xff]  ;;  %1434 = vst [vmem:[%s2090_s16 + $0x7f8] sm:$0xff] %v922_v1  ;;  %v928_v13 = vmax.f32 %v416_v10, 0.0 }
  0xc8   : > { %1435 = vst [vmem:[%s2090_s16 + $0x800] sm:$0xff] %v923_v2  ;;  %1436 = vst [vmem:[%s2090_s16 + $0x808] sm:$0xff] %v924_v3  ;;  %v929_v14 = vmax.f32 %v417_v11, 0.0  ;;  %v930_v15 = vmax.f32 %v418_v12, 0.0  ;;  %v419_v16 = vld [vmem:[%s2075_s3 + $0x840] sm:$0xff]  ;;  %v420_v17 = vld [vmem:[%s2075_s3 + $0x848] sm:$0xff] }
  0xc9   : > { %v421_v18 = vld [vmem:[%s2075_s3 + $0x850] sm:$0xff]  ;;  %1437 = vst [vmem:[%s2090_s16 + $0x810] sm:$0xff] %v925_v7  ;;  %1438 = vst [vmem:[%s2090_s16 + $0x818] sm:$0xff] %v926_v8  ;;  %v931_v19 = vmax.f32 %v419_v16, 0.0  ;;  %v932_v20 = vmax.f32 %v420_v17, 0.0  ;;  %v422_v22 = vld [vmem:[%s2075_s3 + $0x858] sm:$0xff] }
  0xca   : > { %1439 = vst [vmem:[%s2090_s16 + $0x820] sm:$0xff] %v927_v9  ;;  %v933_v21 = vmax.f32 %v421_v18, 0.0  ;;  %v423_v23 = vld [vmem:[%s2075_s3 + $0x860] sm:$0xff]  ;;  %v424_v24 = vld [vmem:[%s2075_s3 + $0x868] sm:$0xff]  ;;  %1440 = vst [vmem:[%s2090_s16 + $0x828] sm:$0xff] %v928_v13  ;;  %v934_v25 = vmax.f32 %v422_v22, 0.0 }
  0xcb   : > { %1441 = vst [vmem:[%s2090_s16 + $0x830] sm:$0xff] %v929_v14  ;;  %1442 = vst [vmem:[%s2090_s16 + $0x838] sm:$0xff] %v930_v15  ;;  %v935_v26 = vmax.f32 %v423_v23, 0.0  ;;  %v936_v27 = vmax.f32 %v424_v24, 0.0  ;;  %v425_v28 = vld [vmem:[%s2075_s3 + $0x870] sm:$0xff]  ;;  %v426_v29 = vld [vmem:[%s2075_s3 + $0x878] sm:$0xff] }
  0xcc   : > { %v427_v30 = vld [vmem:[%s2075_s3 + $0x880] sm:$0xff]  ;;  %1443 = vst [vmem:[%s2090_s16 + $0x840] sm:$0xff] %v931_v19  ;;  %1444 = vst [vmem:[%s2090_s16 + $0x848] sm:$0xff] %v932_v20  ;;  %v937_v31 = vmax.f32 %v425_v28, 0.0  ;;  %v938_v32 = vmax.f32 %v426_v29, 0.0  ;;  %v428_v34 = vld [vmem:[%s2075_s3 + $0x888] sm:$0xff] }
  0xcd   : > { %1445 = vst [vmem:[%s2090_s16 + $0x850] sm:$0xff] %v933_v21  ;;  %v939_v33 = vmax.f32 %v427_v30, 0.0  ;;  %v429_v35 = vld [vmem:[%s2075_s3 + $0x890] sm:$0xff]  ;;  %v430_v36 = vld [vmem:[%s2075_s3 + $0x898] sm:$0xff]  ;;  %1446 = vst [vmem:[%s2090_s16 + $0x858] sm:$0xff] %v934_v25  ;;  %v940_v37 = vmax.f32 %v428_v34, 0.0 }
  0xce   : > { %1447 = vst [vmem:[%s2090_s16 + $0x860] sm:$0xff] %v935_v26  ;;  %1448 = vst [vmem:[%s2090_s16 + $0x868] sm:$0xff] %v936_v27  ;;  %v941_v38 = vmax.f32 %v429_v35, 0.0  ;;  %v942_v39 = vmax.f32 %v430_v36, 0.0  ;;  %v431_v40 = vld [vmem:[%s2075_s3 + $0x8a0] sm:$0xff]  ;;  %v432_v41 = vld [vmem:[%s2075_s3 + $0x8a8] sm:$0xff] }
  0xcf   : > { %v433_v42 = vld [vmem:[%s2075_s3 + $0x8b0] sm:$0xff]  ;;  %1449 = vst [vmem:[%s2090_s16 + $0x870] sm:$0xff] %v937_v31  ;;  %1450 = vst [vmem:[%s2090_s16 + $0x878] sm:$0xff] %v938_v32  ;;  %v943_v43 = vmax.f32 %v431_v40, 0.0  ;;  %v944_v44 = vmax.f32 %v432_v41, 0.0  ;;  %v434_v46 = vld [vmem:[%s2075_s3 + $0x8b8] sm:$0xff] }
  0xd0   : > { %1451 = vst [vmem:[%s2090_s16 + $0x880] sm:$0xff] %v939_v33  ;;  %v945_v45 = vmax.f32 %v433_v42, 0.0  ;;  %v435_v47 = vld [vmem:[%s2075_s3 + $0x8c0] sm:$0xff]  ;;  %v436_v48 = vld [vmem:[%s2075_s3 + $0x8c8] sm:$0xff]  ;;  %1452 = vst [vmem:[%s2090_s16 + $0x888] sm:$0xff] %v940_v37  ;;  %v946_v49 = vmax.f32 %v434_v46, 0.0 }
  0xd1   : > { %1453 = vst [vmem:[%s2090_s16 + $0x890] sm:$0xff] %v941_v38  ;;  %1454 = vst [vmem:[%s2090_s16 + $0x898] sm:$0xff] %v942_v39  ;;  %v947_v50 = vmax.f32 %v435_v47, 0.0  ;;  %v948_v51 = vmax.f32 %v436_v48, 0.0  ;;  %v437_v52 = vld [vmem:[%s2075_s3 + $0x8d0] sm:$0xff]  ;;  %v438_v53 = vld [vmem:[%s2075_s3 + $0x8d8] sm:$0xff] }
  0xd2   : > { %v439_v54 = vld [vmem:[%s2075_s3 + $0x8e0] sm:$0xff]  ;;  %1455 = vst [vmem:[%s2090_s16 + $0x8a0] sm:$0xff] %v943_v43  ;;  %1456 = vst [vmem:[%s2090_s16 + $0x8a8] sm:$0xff] %v944_v44  ;;  %v949_v55 = vmax.f32 %v437_v52, 0.0  ;;  %v950_v56 = vmax.f32 %v438_v53, 0.0  ;;  %v440_v58 = vld [vmem:[%s2075_s3 + $0x8e8] sm:$0xff] }
  0xd3   : > { %1457 = vst [vmem:[%s2090_s16 + $0x8b0] sm:$0xff] %v945_v45  ;;  %v951_v57 = vmax.f32 %v439_v54, 0.0  ;;  %v441_v59 = vld [vmem:[%s2075_s3 + $0x8f0] sm:$0xff]  ;;  %v442_v60 = vld [vmem:[%s2075_s3 + $0x8f8] sm:$0xff]  ;;  %1458 = vst [vmem:[%s2090_s16 + $0x8b8] sm:$0xff] %v946_v49  ;;  %v952_v61 = vmax.f32 %v440_v58, 0.0 }
  0xd4   : > { %1459 = vst [vmem:[%s2090_s16 + $0x8c0] sm:$0xff] %v947_v50  ;;  %1460 = vst [vmem:[%s2090_s16 + $0x8c8] sm:$0xff] %v948_v51  ;;  %v953_v62 = vmax.f32 %v441_v59, 0.0  ;;  %v954_v63 = vmax.f32 %v442_v60, 0.0  ;;  %v443_v0 = vld [vmem:[%s2075_s3 + $0x900] sm:$0xff]  ;;  %v444_v1 = vld [vmem:[%s2075_s3 + $0x908] sm:$0xff] }
  0xd5   : > { %v445_v2 = vld [vmem:[%s2075_s3 + $0x910] sm:$0xff]  ;;  %1461 = vst [vmem:[%s2090_s16 + $0x8d0] sm:$0xff] %v949_v55  ;;  %1462 = vst [vmem:[%s2090_s16 + $0x8d8] sm:$0xff] %v950_v56  ;;  %v955_v3 = vmax.f32 %v443_v0, 0.0  ;;  %v956_v4 = vmax.f32 %v444_v1, 0.0  ;;  %v446_v6 = vld [vmem:[%s2075_s3 + $0x918] sm:$0xff] }
  0xd6   : > { %1463 = vst [vmem:[%s2090_s16 + $0x8e0] sm:$0xff] %v951_v57  ;;  %v957_v5 = vmax.f32 %v445_v2, 0.0  ;;  %v447_v7 = vld [vmem:[%s2075_s3 + $0x920] sm:$0xff]  ;;  %v448_v8 = vld [vmem:[%s2075_s3 + $0x928] sm:$0xff]  ;;  %1464 = vst [vmem:[%s2090_s16 + $0x8e8] sm:$0xff] %v952_v61  ;;  %v958_v9 = vmax.f32 %v446_v6, 0.0 }
  0xd7   : > { %1465 = vst [vmem:[%s2090_s16 + $0x8f0] sm:$0xff] %v953_v62  ;;  %1466 = vst [vmem:[%s2090_s16 + $0x8f8] sm:$0xff] %v954_v63  ;;  %v959_v10 = vmax.f32 %v447_v7, 0.0  ;;  %v960_v11 = vmax.f32 %v448_v8, 0.0  ;;  %v449_v12 = vld [vmem:[%s2075_s3 + $0x930] sm:$0xff]  ;;  %v450_v13 = vld [vmem:[%s2075_s3 + $0x938] sm:$0xff] }
  0xd8   : > { %v451_v14 = vld [vmem:[%s2075_s3 + $0x940] sm:$0xff]  ;;  %1467 = vst [vmem:[%s2090_s16 + $0x900] sm:$0xff] %v955_v3  ;;  %1468 = vst [vmem:[%s2090_s16 + $0x908] sm:$0xff] %v956_v4  ;;  %v961_v15 = vmax.f32 %v449_v12, 0.0  ;;  %v962_v16 = vmax.f32 %v450_v13, 0.0  ;;  %v452_v18 = vld [vmem:[%s2075_s3 + $0x948] sm:$0xff] }
  0xd9   : > { %1469 = vst [vmem:[%s2090_s16 + $0x910] sm:$0xff] %v957_v5  ;;  %v963_v17 = vmax.f32 %v451_v14, 0.0  ;;  %v453_v19 = vld [vmem:[%s2075_s3 + $0x950] sm:$0xff]  ;;  %v454_v20 = vld [vmem:[%s2075_s3 + $0x958] sm:$0xff]  ;;  %1470 = vst [vmem:[%s2090_s16 + $0x918] sm:$0xff] %v958_v9  ;;  %v964_v21 = vmax.f32 %v452_v18, 0.0 }
  0xda   : > { %1471 = vst [vmem:[%s2090_s16 + $0x920] sm:$0xff] %v959_v10  ;;  %1472 = vst [vmem:[%s2090_s16 + $0x928] sm:$0xff] %v960_v11  ;;  %v965_v22 = vmax.f32 %v453_v19, 0.0  ;;  %v966_v23 = vmax.f32 %v454_v20, 0.0  ;;  %v455_v24 = vld [vmem:[%s2075_s3 + $0x960] sm:$0xff]  ;;  %v456_v25 = vld [vmem:[%s2075_s3 + $0x968] sm:$0xff] }
  0xdb   : > { %v457_v26 = vld [vmem:[%s2075_s3 + $0x970] sm:$0xff]  ;;  %1473 = vst [vmem:[%s2090_s16 + $0x930] sm:$0xff] %v961_v15  ;;  %1474 = vst [vmem:[%s2090_s16 + $0x938] sm:$0xff] %v962_v16  ;;  %v967_v27 = vmax.f32 %v455_v24, 0.0  ;;  %v968_v28 = vmax.f32 %v456_v25, 0.0  ;;  %v458_v30 = vld [vmem:[%s2075_s3 + $0x978] sm:$0xff] }
  0xdc   : > { %1475 = vst [vmem:[%s2090_s16 + $0x940] sm:$0xff] %v963_v17  ;;  %v969_v29 = vmax.f32 %v457_v26, 0.0  ;;  %v459_v31 = vld [vmem:[%s2075_s3 + $0x980] sm:$0xff]  ;;  %v460_v32 = vld [vmem:[%s2075_s3 + $0x988] sm:$0xff]  ;;  %1476 = vst [vmem:[%s2090_s16 + $0x948] sm:$0xff] %v964_v21  ;;  %v970_v33 = vmax.f32 %v458_v30, 0.0 }
  0xdd   : > { %1477 = vst [vmem:[%s2090_s16 + $0x950] sm:$0xff] %v965_v22  ;;  %1478 = vst [vmem:[%s2090_s16 + $0x958] sm:$0xff] %v966_v23  ;;  %v971_v34 = vmax.f32 %v459_v31, 0.0  ;;  %v972_v35 = vmax.f32 %v460_v32, 0.0  ;;  %v461_v36 = vld [vmem:[%s2075_s3 + $0x990] sm:$0xff]  ;;  %v462_v37 = vld [vmem:[%s2075_s3 + $0x998] sm:$0xff] }
  0xde   : > { %v463_v38 = vld [vmem:[%s2075_s3 + $0x9a0] sm:$0xff]  ;;  %1479 = vst [vmem:[%s2090_s16 + $0x960] sm:$0xff] %v967_v27  ;;  %1480 = vst [vmem:[%s2090_s16 + $0x968] sm:$0xff] %v968_v28  ;;  %v973_v39 = vmax.f32 %v461_v36, 0.0  ;;  %v974_v40 = vmax.f32 %v462_v37, 0.0  ;;  %v464_v42 = vld [vmem:[%s2075_s3 + $0x9a8] sm:$0xff] }
  0xdf   : > { %1481 = vst [vmem:[%s2090_s16 + $0x970] sm:$0xff] %v969_v29  ;;  %v975_v41 = vmax.f32 %v463_v38, 0.0  ;;  %v465_v43 = vld [vmem:[%s2075_s3 + $0x9b0] sm:$0xff]  ;;  %v466_v44 = vld [vmem:[%s2075_s3 + $0x9b8] sm:$0xff]  ;;  %1482 = vst [vmem:[%s2090_s16 + $0x978] sm:$0xff] %v970_v33  ;;  %v976_v45 = vmax.f32 %v464_v42, 0.0 }
  0xe0   : > { %1483 = vst [vmem:[%s2090_s16 + $0x980] sm:$0xff] %v971_v34  ;;  %1484 = vst [vmem:[%s2090_s16 + $0x988] sm:$0xff] %v972_v35  ;;  %v977_v46 = vmax.f32 %v465_v43, 0.0  ;;  %v978_v47 = vmax.f32 %v466_v44, 0.0  ;;  %v467_v48 = vld [vmem:[%s2075_s3 + $0x9c0] sm:$0xff]  ;;  %v468_v49 = vld [vmem:[%s2075_s3 + $0x9c8] sm:$0xff] }
  0xe1   : > { %v469_v50 = vld [vmem:[%s2075_s3 + $0x9d0] sm:$0xff]  ;;  %1485 = vst [vmem:[%s2090_s16 + $0x990] sm:$0xff] %v973_v39  ;;  %1486 = vst [vmem:[%s2090_s16 + $0x998] sm:$0xff] %v974_v40  ;;  %v979_v51 = vmax.f32 %v467_v48, 0.0  ;;  %v980_v52 = vmax.f32 %v468_v49, 0.0  ;;  %v470_v54 = vld [vmem:[%s2075_s3 + $0x9d8] sm:$0xff] }
  0xe2   : > { %1487 = vst [vmem:[%s2090_s16 + $0x9a0] sm:$0xff] %v975_v41  ;;  %v981_v53 = vmax.f32 %v469_v50, 0.0  ;;  %v471_v55 = vld [vmem:[%s2075_s3 + $0x9e0] sm:$0xff]  ;;  %v472_v56 = vld [vmem:[%s2075_s3 + $0x9e8] sm:$0xff]  ;;  %1488 = vst [vmem:[%s2090_s16 + $0x9a8] sm:$0xff] %v976_v45  ;;  %v982_v57 = vmax.f32 %v470_v54, 0.0 }
  0xe3   : > { %1489 = vst [vmem:[%s2090_s16 + $0x9b0] sm:$0xff] %v977_v46  ;;  %1490 = vst [vmem:[%s2090_s16 + $0x9b8] sm:$0xff] %v978_v47  ;;  %v983_v58 = vmax.f32 %v471_v55, 0.0  ;;  %v984_v59 = vmax.f32 %v472_v56, 0.0  ;;  %v473_v60 = vld [vmem:[%s2075_s3 + $0x9f0] sm:$0xff]  ;;  %v474_v61 = vld [vmem:[%s2075_s3 + $0x9f8] sm:$0xff] }
  0xe4   : > { %v475_v62 = vld [vmem:[%s2075_s3 + $0xa00] sm:$0xff]  ;;  %1491 = vst [vmem:[%s2090_s16 + $0x9c0] sm:$0xff] %v979_v51  ;;  %1492 = vst [vmem:[%s2090_s16 + $0x9c8] sm:$0xff] %v980_v52  ;;  %v985_v63 = vmax.f32 %v473_v60, 0.0  ;;  %v986_v0 = vmax.f32 %v474_v61, 0.0  ;;  %v476_v2 = vld [vmem:[%s2075_s3 + $0xa08] sm:$0xff] }
  0xe5   : > { %1493 = vst [vmem:[%s2090_s16 + $0x9d0] sm:$0xff] %v981_v53  ;;  %v987_v1 = vmax.f32 %v475_v62, 0.0  ;;  %v477_v3 = vld [vmem:[%s2075_s3 + $0xa10] sm:$0xff]  ;;  %v478_v4 = vld [vmem:[%s2075_s3 + $0xa18] sm:$0xff]  ;;  %1494 = vst [vmem:[%s2090_s16 + $0x9d8] sm:$0xff] %v982_v57  ;;  %v988_v5 = vmax.f32 %v476_v2, 0.0 }
  0xe6   : > { %1495 = vst [vmem:[%s2090_s16 + $0x9e0] sm:$0xff] %v983_v58  ;;  %1496 = vst [vmem:[%s2090_s16 + $0x9e8] sm:$0xff] %v984_v59  ;;  %v989_v6 = vmax.f32 %v477_v3, 0.0  ;;  %v990_v7 = vmax.f32 %v478_v4, 0.0  ;;  %v479_v8 = vld [vmem:[%s2075_s3 + $0xa20] sm:$0xff]  ;;  %v480_v9 = vld [vmem:[%s2075_s3 + $0xa28] sm:$0xff] }
  0xe7   : > { %v481_v10 = vld [vmem:[%s2075_s3 + $0xa30] sm:$0xff]  ;;  %1497 = vst [vmem:[%s2090_s16 + $0x9f0] sm:$0xff] %v985_v63  ;;  %1498 = vst [vmem:[%s2090_s16 + $0x9f8] sm:$0xff] %v986_v0  ;;  %v991_v11 = vmax.f32 %v479_v8, 0.0  ;;  %v992_v12 = vmax.f32 %v480_v9, 0.0  ;;  %v482_v14 = vld [vmem:[%s2075_s3 + $0xa38] sm:$0xff] }
  0xe8   : > { %1499 = vst [vmem:[%s2090_s16 + $0xa00] sm:$0xff] %v987_v1  ;;  %v993_v13 = vmax.f32 %v481_v10, 0.0  ;;  %v483_v15 = vld [vmem:[%s2075_s3 + $0xa40] sm:$0xff]  ;;  %v484_v16 = vld [vmem:[%s2075_s3 + $0xa48] sm:$0xff]  ;;  %1500 = vst [vmem:[%s2090_s16 + $0xa08] sm:$0xff] %v988_v5  ;;  %v994_v17 = vmax.f32 %v482_v14, 0.0 }
  0xe9   : > { %1501 = vst [vmem:[%s2090_s16 + $0xa10] sm:$0xff] %v989_v6  ;;  %1502 = vst [vmem:[%s2090_s16 + $0xa18] sm:$0xff] %v990_v7  ;;  %v995_v18 = vmax.f32 %v483_v15, 0.0  ;;  %v996_v19 = vmax.f32 %v484_v16, 0.0  ;;  %v485_v20 = vld [vmem:[%s2075_s3 + $0xa50] sm:$0xff]  ;;  %v486_v21 = vld [vmem:[%s2075_s3 + $0xa58] sm:$0xff] }
  0xea   : > { %v487_v22 = vld [vmem:[%s2075_s3 + $0xa60] sm:$0xff]  ;;  %1503 = vst [vmem:[%s2090_s16 + $0xa20] sm:$0xff] %v991_v11  ;;  %1504 = vst [vmem:[%s2090_s16 + $0xa28] sm:$0xff] %v992_v12  ;;  %v997_v23 = vmax.f32 %v485_v20, 0.0  ;;  %v998_v24 = vmax.f32 %v486_v21, 0.0  ;;  %v488_v26 = vld [vmem:[%s2075_s3 + $0xa68] sm:$0xff] }
  0xeb   : > { %1505 = vst [vmem:[%s2090_s16 + $0xa30] sm:$0xff] %v993_v13  ;;  %v999_v25 = vmax.f32 %v487_v22, 0.0  ;;  %v489_v27 = vld [vmem:[%s2075_s3 + $0xa70] sm:$0xff]  ;;  %v490_v28 = vld [vmem:[%s2075_s3 + $0xa78] sm:$0xff]  ;;  %1506 = vst [vmem:[%s2090_s16 + $0xa38] sm:$0xff] %v994_v17  ;;  %v1000_v29 = vmax.f32 %v488_v26, 0.0 }
  0xec   : > { %1507 = vst [vmem:[%s2090_s16 + $0xa40] sm:$0xff] %v995_v18  ;;  %1508 = vst [vmem:[%s2090_s16 + $0xa48] sm:$0xff] %v996_v19  ;;  %v1001_v30 = vmax.f32 %v489_v27, 0.0  ;;  %v1002_v31 = vmax.f32 %v490_v28, 0.0  ;;  %v491_v32 = vld [vmem:[%s2075_s3 + $0xa80] sm:$0xff]  ;;  %v492_v33 = vld [vmem:[%s2075_s3 + $0xa88] sm:$0xff] }
  0xed   : > { %v493_v34 = vld [vmem:[%s2075_s3 + $0xa90] sm:$0xff]  ;;  %1509 = vst [vmem:[%s2090_s16 + $0xa50] sm:$0xff] %v997_v23  ;;  %1510 = vst [vmem:[%s2090_s16 + $0xa58] sm:$0xff] %v998_v24  ;;  %v1003_v35 = vmax.f32 %v491_v32, 0.0  ;;  %v1004_v36 = vmax.f32 %v492_v33, 0.0  ;;  %v494_v38 = vld [vmem:[%s2075_s3 + $0xa98] sm:$0xff] }
  0xee   : > { %1511 = vst [vmem:[%s2090_s16 + $0xa60] sm:$0xff] %v999_v25  ;;  %v1005_v37 = vmax.f32 %v493_v34, 0.0  ;;  %v495_v39 = vld [vmem:[%s2075_s3 + $0xaa0] sm:$0xff]  ;;  %v496_v40 = vld [vmem:[%s2075_s3 + $0xaa8] sm:$0xff]  ;;  %1512 = vst [vmem:[%s2090_s16 + $0xa68] sm:$0xff] %v1000_v29  ;;  %v1006_v41 = vmax.f32 %v494_v38, 0.0 }
  0xef   : > { %1513 = vst [vmem:[%s2090_s16 + $0xa70] sm:$0xff] %v1001_v30  ;;  %1514 = vst [vmem:[%s2090_s16 + $0xa78] sm:$0xff] %v1002_v31  ;;  %v1007_v42 = vmax.f32 %v495_v39, 0.0  ;;  %v1008_v43 = vmax.f32 %v496_v40, 0.0  ;;  %v497_v44 = vld [vmem:[%s2075_s3 + $0xab0] sm:$0xff]  ;;  %v498_v45 = vld [vmem:[%s2075_s3 + $0xab8] sm:$0xff] }
  0xf0   : > { %v499_v46 = vld [vmem:[%s2075_s3 + $0xac0] sm:$0xff]  ;;  %1515 = vst [vmem:[%s2090_s16 + $0xa80] sm:$0xff] %v1003_v35  ;;  %1516 = vst [vmem:[%s2090_s16 + $0xa88] sm:$0xff] %v1004_v36  ;;  %v1009_v47 = vmax.f32 %v497_v44, 0.0  ;;  %v1010_v48 = vmax.f32 %v498_v45, 0.0  ;;  %v500_v50 = vld [vmem:[%s2075_s3 + $0xac8] sm:$0xff] }
  0xf1   : > { %1517 = vst [vmem:[%s2090_s16 + $0xa90] sm:$0xff] %v1005_v37  ;;  %v1011_v49 = vmax.f32 %v499_v46, 0.0  ;;  %v501_v51 = vld [vmem:[%s2075_s3 + $0xad0] sm:$0xff]  ;;  %v502_v52 = vld [vmem:[%s2075_s3 + $0xad8] sm:$0xff]  ;;  %1518 = vst [vmem:[%s2090_s16 + $0xa98] sm:$0xff] %v1006_v41  ;;  %v1012_v53 = vmax.f32 %v500_v50, 0.0 }
  0xf2   : > { %1519 = vst [vmem:[%s2090_s16 + $0xaa0] sm:$0xff] %v1007_v42  ;;  %1520 = vst [vmem:[%s2090_s16 + $0xaa8] sm:$0xff] %v1008_v43  ;;  %v1013_v54 = vmax.f32 %v501_v51, 0.0  ;;  %v1014_v55 = vmax.f32 %v502_v52, 0.0  ;;  %v503_v56 = vld [vmem:[%s2075_s3 + $0xae0] sm:$0xff]  ;;  %v504_v57 = vld [vmem:[%s2075_s3 + $0xae8] sm:$0xff] }
  0xf3   : > { %v505_v58 = vld [vmem:[%s2075_s3 + $0xaf0] sm:$0xff]  ;;  %1521 = vst [vmem:[%s2090_s16 + $0xab0] sm:$0xff] %v1009_v47  ;;  %1522 = vst [vmem:[%s2090_s16 + $0xab8] sm:$0xff] %v1010_v48  ;;  %v1015_v59 = vmax.f32 %v503_v56, 0.0  ;;  %v1016_v60 = vmax.f32 %v504_v57, 0.0  ;;  %v506_v62 = vld [vmem:[%s2075_s3 + $0xaf8] sm:$0xff] }
  0xf4   : > { %1523 = vst [vmem:[%s2090_s16 + $0xac0] sm:$0xff] %v1011_v49  ;;  %v1017_v61 = vmax.f32 %v505_v58, 0.0  ;;  %v507_v63 = vld [vmem:[%s2075_s3 + $0xb00] sm:$0xff]  ;;  %v508_v0 = vld [vmem:[%s2075_s3 + $0xb08] sm:$0xff]  ;;  %1524 = vst [vmem:[%s2090_s16 + $0xac8] sm:$0xff] %v1012_v53  ;;  %v1018_v1 = vmax.f32 %v506_v62, 0.0 }
  0xf5   : > { %1525 = vst [vmem:[%s2090_s16 + $0xad0] sm:$0xff] %v1013_v54  ;;  %1526 = vst [vmem:[%s2090_s16 + $0xad8] sm:$0xff] %v1014_v55  ;;  %v1019_v2 = vmax.f32 %v507_v63, 0.0  ;;  %v1020_v3 = vmax.f32 %v508_v0, 0.0  ;;  %v509_v4 = vld [vmem:[%s2075_s3 + $0xb10] sm:$0xff]  ;;  %v510_v5 = vld [vmem:[%s2075_s3 + $0xb18] sm:$0xff] }
  0xf6   : > { %v511_v6 = vld [vmem:[%s2075_s3 + $0xb20] sm:$0xff]  ;;  %1527 = vst [vmem:[%s2090_s16 + $0xae0] sm:$0xff] %v1015_v59  ;;  %1528 = vst [vmem:[%s2090_s16 + $0xae8] sm:$0xff] %v1016_v60  ;;  %v1021_v7 = vmax.f32 %v509_v4, 0.0  ;;  %v1022_v8 = vmax.f32 %v510_v5, 0.0  ;;  %v512_v10 = vld [vmem:[%s2075_s3 + $0xb28] sm:$0xff] }
  0xf7   : > { %1529 = vst [vmem:[%s2090_s16 + $0xaf0] sm:$0xff] %v1017_v61  ;;  %v1023_v9 = vmax.f32 %v511_v6, 0.0  ;;  %v513_v11 = vld [vmem:[%s2075_s3 + $0xb30] sm:$0xff]  ;;  %v514_v12 = vld [vmem:[%s2075_s3 + $0xb38] sm:$0xff]  ;;  %1530 = vst [vmem:[%s2090_s16 + $0xaf8] sm:$0xff] %v1018_v1  ;;  %v1024_v13 = vmax.f32 %v512_v10, 0.0 }
  0xf8   : > { %1531 = vst [vmem:[%s2090_s16 + $0xb00] sm:$0xff] %v1019_v2  ;;  %1532 = vst [vmem:[%s2090_s16 + $0xb08] sm:$0xff] %v1020_v3  ;;  %v1025_v14 = vmax.f32 %v513_v11, 0.0  ;;  %v1026_v15 = vmax.f32 %v514_v12, 0.0  ;;  %v515_v16 = vld [vmem:[%s2075_s3 + $0xb40] sm:$0xff]  ;;  %v516_v17 = vld [vmem:[%s2075_s3 + $0xb48] sm:$0xff] }
  0xf9   : > { %v517_v18 = vld [vmem:[%s2075_s3 + $0xb50] sm:$0xff]  ;;  %1533 = vst [vmem:[%s2090_s16 + $0xb10] sm:$0xff] %v1021_v7  ;;  %1534 = vst [vmem:[%s2090_s16 + $0xb18] sm:$0xff] %v1022_v8  ;;  %v1027_v19 = vmax.f32 %v515_v16, 0.0  ;;  %v1028_v20 = vmax.f32 %v516_v17, 0.0  ;;  %v518_v22 = vld [vmem:[%s2075_s3 + $0xb58] sm:$0xff] }
  0xfa   : > { %1535 = vst [vmem:[%s2090_s16 + $0xb20] sm:$0xff] %v1023_v9  ;;  %v1029_v21 = vmax.f32 %v517_v18, 0.0  ;;  %v519_v23 = vld [vmem:[%s2075_s3 + $0xb60] sm:$0xff]  ;;  %v520_v24 = vld [vmem:[%s2075_s3 + $0xb68] sm:$0xff]  ;;  %1536 = vst [vmem:[%s2090_s16 + $0xb28] sm:$0xff] %v1024_v13  ;;  %v1030_v25 = vmax.f32 %v518_v22, 0.0 }
  0xfb   : > { %1537 = vst [vmem:[%s2090_s16 + $0xb30] sm:$0xff] %v1025_v14  ;;  %1538 = vst [vmem:[%s2090_s16 + $0xb38] sm:$0xff] %v1026_v15  ;;  %v1031_v26 = vmax.f32 %v519_v23, 0.0  ;;  %v1032_v27 = vmax.f32 %v520_v24, 0.0  ;;  %v521_v28 = vld [vmem:[%s2075_s3 + $0xb70] sm:$0xff]  ;;  %v522_v29 = vld [vmem:[%s2075_s3 + $0xb78] sm:$0xff] }
  0xfc   : > { %v523_v30 = vld [vmem:[%s2075_s3 + $0xb80] sm:$0xff]  ;;  %1539 = vst [vmem:[%s2090_s16 + $0xb40] sm:$0xff] %v1027_v19  ;;  %1540 = vst [vmem:[%s2090_s16 + $0xb48] sm:$0xff] %v1028_v20  ;;  %v1033_v31 = vmax.f32 %v521_v28, 0.0  ;;  %v1034_v32 = vmax.f32 %v522_v29, 0.0  ;;  %v524_v34 = vld [vmem:[%s2075_s3 + $0xb88] sm:$0xff] }
  0xfd   : > { %1541 = vst [vmem:[%s2090_s16 + $0xb50] sm:$0xff] %v1029_v21  ;;  %v1035_v33 = vmax.f32 %v523_v30, 0.0  ;;  %v525_v35 = vld [vmem:[%s2075_s3 + $0xb90] sm:$0xff]  ;;  %v526_v36 = vld [vmem:[%s2075_s3 + $0xb98] sm:$0xff]  ;;  %1542 = vst [vmem:[%s2090_s16 + $0xb58] sm:$0xff] %v1030_v25  ;;  %v1036_v37 = vmax.f32 %v524_v34, 0.0 }
  0xfe   : > { %1543 = vst [vmem:[%s2090_s16 + $0xb60] sm:$0xff] %v1031_v26  ;;  %1544 = vst [vmem:[%s2090_s16 + $0xb68] sm:$0xff] %v1032_v27  ;;  %v1037_v38 = vmax.f32 %v525_v35, 0.0  ;;  %v1038_v39 = vmax.f32 %v526_v36, 0.0  ;;  %v527_v40 = vld [vmem:[%s2075_s3 + $0xba0] sm:$0xff]  ;;  %v528_v41 = vld [vmem:[%s2075_s3 + $0xba8] sm:$0xff] }
  0xff   : > { %v529_v42 = vld [vmem:[%s2075_s3 + $0xbb0] sm:$0xff]  ;;  %1545 = vst [vmem:[%s2090_s16 + $0xb70] sm:$0xff] %v1033_v31  ;;  %1546 = vst [vmem:[%s2090_s16 + $0xb78] sm:$0xff] %v1034_v32  ;;  %v1039_v43 = vmax.f32 %v527_v40, 0.0  ;;  %v1040_v44 = vmax.f32 %v528_v41, 0.0  ;;  %v530_v46 = vld [vmem:[%s2075_s3 + $0xbb8] sm:$0xff] }
 0x100   : > { %1547 = vst [vmem:[%s2090_s16 + $0xb80] sm:$0xff] %v1035_v33  ;;  %v1041_v45 = vmax.f32 %v529_v42, 0.0  ;;  %v531_v47 = vld [vmem:[%s2075_s3 + $0xbc0] sm:$0xff]  ;;  %v532_v48 = vld [vmem:[%s2075_s3 + $0xbc8] sm:$0xff]  ;;  %1548 = vst [vmem:[%s2090_s16 + $0xb88] sm:$0xff] %v1036_v37  ;;  %v1042_v49 = vmax.f32 %v530_v46, 0.0 }
 0x101   : > { %1549 = vst [vmem:[%s2090_s16 + $0xb90] sm:$0xff] %v1037_v38  ;;  %1550 = vst [vmem:[%s2090_s16 + $0xb98] sm:$0xff] %v1038_v39  ;;  %v1043_v50 = vmax.f32 %v531_v47, 0.0  ;;  %v1044_v51 = vmax.f32 %v532_v48, 0.0  ;;  %v533_v52 = vld [vmem:[%s2075_s3 + $0xbd0] sm:$0xff]  ;;  %v534_v53 = vld [vmem:[%s2075_s3 + $0xbd8] sm:$0xff] }
 0x102   : > { %v535_v54 = vld [vmem:[%s2075_s3 + $0xbe0] sm:$0xff]  ;;  %1551 = vst [vmem:[%s2090_s16 + $0xba0] sm:$0xff] %v1039_v43  ;;  %1552 = vst [vmem:[%s2090_s16 + $0xba8] sm:$0xff] %v1040_v44  ;;  %v1045_v55 = vmax.f32 %v533_v52, 0.0  ;;  %v1046_v56 = vmax.f32 %v534_v53, 0.0  ;;  %v536_v58 = vld [vmem:[%s2075_s3 + $0xbe8] sm:$0xff] }
 0x103   : > { %1553 = vst [vmem:[%s2090_s16 + $0xbb0] sm:$0xff] %v1041_v45  ;;  %v1047_v57 = vmax.f32 %v535_v54, 0.0  ;;  %v537_v59 = vld [vmem:[%s2075_s3 + $0xbf0] sm:$0xff]  ;;  %v538_v60 = vld [vmem:[%s2075_s3 + $0xbf8] sm:$0xff]  ;;  %1554 = vst [vmem:[%s2090_s16 + $0xbb8] sm:$0xff] %v1042_v49  ;;  %v1048_v61 = vmax.f32 %v536_v58, 0.0 }
 0x104   : > { %1555 = vst [vmem:[%s2090_s16 + $0xbc0] sm:$0xff] %v1043_v50  ;;  %1556 = vst [vmem:[%s2090_s16 + $0xbc8] sm:$0xff] %v1044_v51  ;;  %v1049_v62 = vmax.f32 %v537_v59, 0.0  ;;  %v1050_v63 = vmax.f32 %v538_v60, 0.0  ;;  %v539_v0 = vld [vmem:[%s2075_s3 + $0xc00] sm:$0xff]  ;;  %v540_v1 = vld [vmem:[%s2075_s3 + $0xc08] sm:$0xff] }
 0x105   : > { %v541_v2 = vld [vmem:[%s2075_s3 + $0xc10] sm:$0xff]  ;;  %1557 = vst [vmem:[%s2090_s16 + $0xbd0] sm:$0xff] %v1045_v55  ;;  %1558 = vst [vmem:[%s2090_s16 + $0xbd8] sm:$0xff] %v1046_v56  ;;  %v1051_v3 = vmax.f32 %v539_v0, 0.0  ;;  %v1052_v4 = vmax.f32 %v540_v1, 0.0  ;;  %v542_v6 = vld [vmem:[%s2075_s3 + $0xc18] sm:$0xff] }
 0x106   : > { %1559 = vst [vmem:[%s2090_s16 + $0xbe0] sm:$0xff] %v1047_v57  ;;  %v1053_v5 = vmax.f32 %v541_v2, 0.0  ;;  %v543_v7 = vld [vmem:[%s2075_s3 + $0xc20] sm:$0xff]  ;;  %v544_v8 = vld [vmem:[%s2075_s3 + $0xc28] sm:$0xff]  ;;  %1560 = vst [vmem:[%s2090_s16 + $0xbe8] sm:$0xff] %v1048_v61  ;;  %v1054_v9 = vmax.f32 %v542_v6, 0.0 }
 0x107   : > { %1561 = vst [vmem:[%s2090_s16 + $0xbf0] sm:$0xff] %v1049_v62  ;;  %1562 = vst [vmem:[%s2090_s16 + $0xbf8] sm:$0xff] %v1050_v63  ;;  %v1055_v10 = vmax.f32 %v543_v7, 0.0  ;;  %v1056_v11 = vmax.f32 %v544_v8, 0.0  ;;  %v545_v12 = vld [vmem:[%s2075_s3 + $0xc30] sm:$0xff]  ;;  %v546_v13 = vld [vmem:[%s2075_s3 + $0xc38] sm:$0xff] }
 0x108   : > { %v547_v14 = vld [vmem:[%s2075_s3 + $0xc40] sm:$0xff]  ;;  %1563 = vst [vmem:[%s2090_s16 + $0xc00] sm:$0xff] %v1051_v3  ;;  %1564 = vst [vmem:[%s2090_s16 + $0xc08] sm:$0xff] %v1052_v4  ;;  %v1057_v15 = vmax.f32 %v545_v12, 0.0  ;;  %v1058_v16 = vmax.f32 %v546_v13, 0.0  ;;  %v548_v18 = vld [vmem:[%s2075_s3 + $0xc48] sm:$0xff] }
 0x109   : > { %1565 = vst [vmem:[%s2090_s16 + $0xc10] sm:$0xff] %v1053_v5  ;;  %v1059_v17 = vmax.f32 %v547_v14, 0.0  ;;  %v549_v19 = vld [vmem:[%s2075_s3 + $0xc50] sm:$0xff]  ;;  %v550_v20 = vld [vmem:[%s2075_s3 + $0xc58] sm:$0xff]  ;;  %1566 = vst [vmem:[%s2090_s16 + $0xc18] sm:$0xff] %v1054_v9  ;;  %v1060_v21 = vmax.f32 %v548_v18, 0.0 }
 0x10a   : > { %1567 = vst [vmem:[%s2090_s16 + $0xc20] sm:$0xff] %v1055_v10  ;;  %1568 = vst [vmem:[%s2090_s16 + $0xc28] sm:$0xff] %v1056_v11  ;;  %v1061_v22 = vmax.f32 %v549_v19, 0.0  ;;  %v1062_v23 = vmax.f32 %v550_v20, 0.0  ;;  %v551_v24 = vld [vmem:[%s2075_s3 + $0xc60] sm:$0xff]  ;;  %v552_v25 = vld [vmem:[%s2075_s3 + $0xc68] sm:$0xff] }
 0x10b   : > { %v553_v26 = vld [vmem:[%s2075_s3 + $0xc70] sm:$0xff]  ;;  %1569 = vst [vmem:[%s2090_s16 + $0xc30] sm:$0xff] %v1057_v15  ;;  %1570 = vst [vmem:[%s2090_s16 + $0xc38] sm:$0xff] %v1058_v16  ;;  %v1063_v27 = vmax.f32 %v551_v24, 0.0  ;;  %v1064_v28 = vmax.f32 %v552_v25, 0.0  ;;  %v554_v30 = vld [vmem:[%s2075_s3 + $0xc78] sm:$0xff] }
 0x10c   : > { %1571 = vst [vmem:[%s2090_s16 + $0xc40] sm:$0xff] %v1059_v17  ;;  %v1065_v29 = vmax.f32 %v553_v26, 0.0  ;;  %v555_v31 = vld [vmem:[%s2075_s3 + $0xc80] sm:$0xff]  ;;  %v556_v32 = vld [vmem:[%s2075_s3 + $0xc88] sm:$0xff]  ;;  %1572 = vst [vmem:[%s2090_s16 + $0xc48] sm:$0xff] %v1060_v21  ;;  %v1066_v33 = vmax.f32 %v554_v30, 0.0 }
 0x10d   : > { %1573 = vst [vmem:[%s2090_s16 + $0xc50] sm:$0xff] %v1061_v22  ;;  %1574 = vst [vmem:[%s2090_s16 + $0xc58] sm:$0xff] %v1062_v23  ;;  %v1067_v34 = vmax.f32 %v555_v31, 0.0  ;;  %v1068_v35 = vmax.f32 %v556_v32, 0.0  ;;  %v557_v36 = vld [vmem:[%s2075_s3 + $0xc90] sm:$0xff]  ;;  %v558_v37 = vld [vmem:[%s2075_s3 + $0xc98] sm:$0xff] }
 0x10e   : > { %v559_v38 = vld [vmem:[%s2075_s3 + $0xca0] sm:$0xff]  ;;  %1575 = vst [vmem:[%s2090_s16 + $0xc60] sm:$0xff] %v1063_v27  ;;  %1576 = vst [vmem:[%s2090_s16 + $0xc68] sm:$0xff] %v1064_v28  ;;  %v1069_v39 = vmax.f32 %v557_v36, 0.0  ;;  %v1070_v40 = vmax.f32 %v558_v37, 0.0  ;;  %v560_v42 = vld [vmem:[%s2075_s3 + $0xca8] sm:$0xff] }
 0x10f   : > { %1577 = vst [vmem:[%s2090_s16 + $0xc70] sm:$0xff] %v1065_v29  ;;  %v1071_v41 = vmax.f32 %v559_v38, 0.0  ;;  %v561_v43 = vld [vmem:[%s2075_s3 + $0xcb0] sm:$0xff]  ;;  %v562_v44 = vld [vmem:[%s2075_s3 + $0xcb8] sm:$0xff]  ;;  %1578 = vst [vmem:[%s2090_s16 + $0xc78] sm:$0xff] %v1066_v33  ;;  %v1072_v45 = vmax.f32 %v560_v42, 0.0 }
 0x110   : > { %1579 = vst [vmem:[%s2090_s16 + $0xc80] sm:$0xff] %v1067_v34  ;;  %1580 = vst [vmem:[%s2090_s16 + $0xc88] sm:$0xff] %v1068_v35  ;;  %v1073_v46 = vmax.f32 %v561_v43, 0.0  ;;  %v1074_v47 = vmax.f32 %v562_v44, 0.0  ;;  %v563_v48 = vld [vmem:[%s2075_s3 + $0xcc0] sm:$0xff]  ;;  %v564_v49 = vld [vmem:[%s2075_s3 + $0xcc8] sm:$0xff] }
 0x111   : > { %v565_v50 = vld [vmem:[%s2075_s3 + $0xcd0] sm:$0xff]  ;;  %1581 = vst [vmem:[%s2090_s16 + $0xc90] sm:$0xff] %v1069_v39  ;;  %1582 = vst [vmem:[%s2090_s16 + $0xc98] sm:$0xff] %v1070_v40  ;;  %v1075_v51 = vmax.f32 %v563_v48, 0.0  ;;  %v1076_v52 = vmax.f32 %v564_v49, 0.0  ;;  %v566_v54 = vld [vmem:[%s2075_s3 + $0xcd8] sm:$0xff] }
 0x112   : > { %1583 = vst [vmem:[%s2090_s16 + $0xca0] sm:$0xff] %v1071_v41  ;;  %v1077_v53 = vmax.f32 %v565_v50, 0.0  ;;  %v567_v55 = vld [vmem:[%s2075_s3 + $0xce0] sm:$0xff]  ;;  %v568_v56 = vld [vmem:[%s2075_s3 + $0xce8] sm:$0xff]  ;;  %1584 = vst [vmem:[%s2090_s16 + $0xca8] sm:$0xff] %v1072_v45  ;;  %v1078_v57 = vmax.f32 %v566_v54, 0.0 }
 0x113   : > { %1585 = vst [vmem:[%s2090_s16 + $0xcb0] sm:$0xff] %v1073_v46  ;;  %1586 = vst [vmem:[%s2090_s16 + $0xcb8] sm:$0xff] %v1074_v47  ;;  %v1079_v58 = vmax.f32 %v567_v55, 0.0  ;;  %v1080_v59 = vmax.f32 %v568_v56, 0.0  ;;  %v569_v60 = vld [vmem:[%s2075_s3 + $0xcf0] sm:$0xff]  ;;  %v570_v61 = vld [vmem:[%s2075_s3 + $0xcf8] sm:$0xff] }
 0x114   : > { %v571_v62 = vld [vmem:[%s2075_s3 + $0xd00] sm:$0xff]  ;;  %1587 = vst [vmem:[%s2090_s16 + $0xcc0] sm:$0xff] %v1075_v51  ;;  %1588 = vst [vmem:[%s2090_s16 + $0xcc8] sm:$0xff] %v1076_v52  ;;  %v1081_v63 = vmax.f32 %v569_v60, 0.0  ;;  %v1082_v0 = vmax.f32 %v570_v61, 0.0  ;;  %v572_v2 = vld [vmem:[%s2075_s3 + $0xd08] sm:$0xff] }
 0x115   : > { %1589 = vst [vmem:[%s2090_s16 + $0xcd0] sm:$0xff] %v1077_v53  ;;  %v1083_v1 = vmax.f32 %v571_v62, 0.0  ;;  %v573_v3 = vld [vmem:[%s2075_s3 + $0xd10] sm:$0xff]  ;;  %v574_v4 = vld [vmem:[%s2075_s3 + $0xd18] sm:$0xff]  ;;  %1590 = vst [vmem:[%s2090_s16 + $0xcd8] sm:$0xff] %v1078_v57  ;;  %v1084_v5 = vmax.f32 %v572_v2, 0.0 }
 0x116   : > { %1591 = vst [vmem:[%s2090_s16 + $0xce0] sm:$0xff] %v1079_v58  ;;  %1592 = vst [vmem:[%s2090_s16 + $0xce8] sm:$0xff] %v1080_v59  ;;  %v1085_v6 = vmax.f32 %v573_v3, 0.0  ;;  %v1086_v7 = vmax.f32 %v574_v4, 0.0  ;;  %v575_v8 = vld [vmem:[%s2075_s3 + $0xd20] sm:$0xff]  ;;  %v576_v9 = vld [vmem:[%s2075_s3 + $0xd28] sm:$0xff] }
 0x117   : > { %v577_v10 = vld [vmem:[%s2075_s3 + $0xd30] sm:$0xff]  ;;  %1593 = vst [vmem:[%s2090_s16 + $0xcf0] sm:$0xff] %v1081_v63  ;;  %1594 = vst [vmem:[%s2090_s16 + $0xcf8] sm:$0xff] %v1082_v0  ;;  %v1087_v11 = vmax.f32 %v575_v8, 0.0  ;;  %v1088_v12 = vmax.f32 %v576_v9, 0.0  ;;  %v578_v14 = vld [vmem:[%s2075_s3 + $0xd38] sm:$0xff] }
 0x118   : > { %1595 = vst [vmem:[%s2090_s16 + $0xd00] sm:$0xff] %v1083_v1  ;;  %v1089_v13 = vmax.f32 %v577_v10, 0.0  ;;  %v579_v15 = vld [vmem:[%s2075_s3 + $0xd40] sm:$0xff]  ;;  %v580_v16 = vld [vmem:[%s2075_s3 + $0xd48] sm:$0xff]  ;;  %1596 = vst [vmem:[%s2090_s16 + $0xd08] sm:$0xff] %v1084_v5  ;;  %v1090_v17 = vmax.f32 %v578_v14, 0.0 }
 0x119   : > { %1597 = vst [vmem:[%s2090_s16 + $0xd10] sm:$0xff] %v1085_v6  ;;  %1598 = vst [vmem:[%s2090_s16 + $0xd18] sm:$0xff] %v1086_v7  ;;  %v1091_v18 = vmax.f32 %v579_v15, 0.0  ;;  %v1092_v19 = vmax.f32 %v580_v16, 0.0  ;;  %v581_v20 = vld [vmem:[%s2075_s3 + $0xd50] sm:$0xff]  ;;  %v582_v21 = vld [vmem:[%s2075_s3 + $0xd58] sm:$0xff] }
 0x11a   : > { %v583_v22 = vld [vmem:[%s2075_s3 + $0xd60] sm:$0xff]  ;;  %1599 = vst [vmem:[%s2090_s16 + $0xd20] sm:$0xff] %v1087_v11  ;;  %1600 = vst [vmem:[%s2090_s16 + $0xd28] sm:$0xff] %v1088_v12  ;;  %v1093_v23 = vmax.f32 %v581_v20, 0.0  ;;  %v1094_v24 = vmax.f32 %v582_v21, 0.0  ;;  %v584_v26 = vld [vmem:[%s2075_s3 + $0xd68] sm:$0xff] }
 0x11b   : > { %1601 = vst [vmem:[%s2090_s16 + $0xd30] sm:$0xff] %v1089_v13  ;;  %v1095_v25 = vmax.f32 %v583_v22, 0.0  ;;  %v585_v27 = vld [vmem:[%s2075_s3 + $0xd70] sm:$0xff]  ;;  %v586_v28 = vld [vmem:[%s2075_s3 + $0xd78] sm:$0xff]  ;;  %1602 = vst [vmem:[%s2090_s16 + $0xd38] sm:$0xff] %v1090_v17  ;;  %v1096_v29 = vmax.f32 %v584_v26, 0.0 }
 0x11c   : > { %1603 = vst [vmem:[%s2090_s16 + $0xd40] sm:$0xff] %v1091_v18  ;;  %1604 = vst [vmem:[%s2090_s16 + $0xd48] sm:$0xff] %v1092_v19  ;;  %v1097_v30 = vmax.f32 %v585_v27, 0.0  ;;  %v1098_v31 = vmax.f32 %v586_v28, 0.0  ;;  %v587_v32 = vld [vmem:[%s2075_s3 + $0xd80] sm:$0xff]  ;;  %v588_v33 = vld [vmem:[%s2075_s3 + $0xd88] sm:$0xff] }
 0x11d   : > { %v589_v34 = vld [vmem:[%s2075_s3 + $0xd90] sm:$0xff]  ;;  %1605 = vst [vmem:[%s2090_s16 + $0xd50] sm:$0xff] %v1093_v23  ;;  %1606 = vst [vmem:[%s2090_s16 + $0xd58] sm:$0xff] %v1094_v24  ;;  %v1099_v35 = vmax.f32 %v587_v32, 0.0  ;;  %v1100_v36 = vmax.f32 %v588_v33, 0.0  ;;  %v590_v38 = vld [vmem:[%s2075_s3 + $0xd98] sm:$0xff] }
 0x11e   : > { %1607 = vst [vmem:[%s2090_s16 + $0xd60] sm:$0xff] %v1095_v25  ;;  %v1101_v37 = vmax.f32 %v589_v34, 0.0  ;;  %v591_v39 = vld [vmem:[%s2075_s3 + $0xda0] sm:$0xff]  ;;  %v592_v40 = vld [vmem:[%s2075_s3 + $0xda8] sm:$0xff]  ;;  %1608 = vst [vmem:[%s2090_s16 + $0xd68] sm:$0xff] %v1096_v29  ;;  %v1102_v41 = vmax.f32 %v590_v38, 0.0 }
 0x11f   : > { %1609 = vst [vmem:[%s2090_s16 + $0xd70] sm:$0xff] %v1097_v30  ;;  %1610 = vst [vmem:[%s2090_s16 + $0xd78] sm:$0xff] %v1098_v31  ;;  %v1103_v42 = vmax.f32 %v591_v39, 0.0  ;;  %v1104_v43 = vmax.f32 %v592_v40, 0.0  ;;  %v593_v44 = vld [vmem:[%s2075_s3 + $0xdb0] sm:$0xff]  ;;  %v594_v45 = vld [vmem:[%s2075_s3 + $0xdb8] sm:$0xff] }
 0x120   : > { %v595_v46 = vld [vmem:[%s2075_s3 + $0xdc0] sm:$0xff]  ;;  %1611 = vst [vmem:[%s2090_s16 + $0xd80] sm:$0xff] %v1099_v35  ;;  %1612 = vst [vmem:[%s2090_s16 + $0xd88] sm:$0xff] %v1100_v36  ;;  %v1105_v47 = vmax.f32 %v593_v44, 0.0  ;;  %v1106_v48 = vmax.f32 %v594_v45, 0.0  ;;  %v596_v50 = vld [vmem:[%s2075_s3 + $0xdc8] sm:$0xff] }
 0x121   : > { %1613 = vst [vmem:[%s2090_s16 + $0xd90] sm:$0xff] %v1101_v37  ;;  %v1107_v49 = vmax.f32 %v595_v46, 0.0  ;;  %v597_v51 = vld [vmem:[%s2075_s3 + $0xdd0] sm:$0xff]  ;;  %v598_v52 = vld [vmem:[%s2075_s3 + $0xdd8] sm:$0xff]  ;;  %1614 = vst [vmem:[%s2090_s16 + $0xd98] sm:$0xff] %v1102_v41  ;;  %v1108_v53 = vmax.f32 %v596_v50, 0.0 }
 0x122   : > { %1615 = vst [vmem:[%s2090_s16 + $0xda0] sm:$0xff] %v1103_v42  ;;  %1616 = vst [vmem:[%s2090_s16 + $0xda8] sm:$0xff] %v1104_v43  ;;  %v1109_v54 = vmax.f32 %v597_v51, 0.0  ;;  %v1110_v55 = vmax.f32 %v598_v52, 0.0  ;;  %v599_v56 = vld [vmem:[%s2075_s3 + $0xde0] sm:$0xff]  ;;  %v600_v57 = vld [vmem:[%s2075_s3 + $0xde8] sm:$0xff] }
 0x123   : > { %v601_v58 = vld [vmem:[%s2075_s3 + $0xdf0] sm:$0xff]  ;;  %1617 = vst [vmem:[%s2090_s16 + $0xdb0] sm:$0xff] %v1105_v47  ;;  %1618 = vst [vmem:[%s2090_s16 + $0xdb8] sm:$0xff] %v1106_v48  ;;  %v1111_v59 = vmax.f32 %v599_v56, 0.0  ;;  %v1112_v60 = vmax.f32 %v600_v57, 0.0  ;;  %v602_v62 = vld [vmem:[%s2075_s3 + $0xdf8] sm:$0xff] }
 0x124   : > { %1619 = vst [vmem:[%s2090_s16 + $0xdc0] sm:$0xff] %v1107_v49  ;;  %v1113_v61 = vmax.f32 %v601_v58, 0.0  ;;  %v603_v63 = vld [vmem:[%s2075_s3 + $0xe00] sm:$0xff]  ;;  %v604_v0 = vld [vmem:[%s2075_s3 + $0xe08] sm:$0xff]  ;;  %1620 = vst [vmem:[%s2090_s16 + $0xdc8] sm:$0xff] %v1108_v53  ;;  %v1114_v1 = vmax.f32 %v602_v62, 0.0 }
 0x125   : > { %1621 = vst [vmem:[%s2090_s16 + $0xdd0] sm:$0xff] %v1109_v54  ;;  %1622 = vst [vmem:[%s2090_s16 + $0xdd8] sm:$0xff] %v1110_v55  ;;  %v1115_v2 = vmax.f32 %v603_v63, 0.0  ;;  %v1116_v3 = vmax.f32 %v604_v0, 0.0  ;;  %v605_v4 = vld [vmem:[%s2075_s3 + $0xe10] sm:$0xff]  ;;  %v606_v5 = vld [vmem:[%s2075_s3 + $0xe18] sm:$0xff] }
 0x126   : > { %v607_v6 = vld [vmem:[%s2075_s3 + $0xe20] sm:$0xff]  ;;  %1623 = vst [vmem:[%s2090_s16 + $0xde0] sm:$0xff] %v1111_v59  ;;  %1624 = vst [vmem:[%s2090_s16 + $0xde8] sm:$0xff] %v1112_v60  ;;  %v1117_v7 = vmax.f32 %v605_v4, 0.0  ;;  %v1118_v8 = vmax.f32 %v606_v5, 0.0  ;;  %v608_v10 = vld [vmem:[%s2075_s3 + $0xe28] sm:$0xff] }
 0x127   : > { %1625 = vst [vmem:[%s2090_s16 + $0xdf0] sm:$0xff] %v1113_v61  ;;  %v1119_v9 = vmax.f32 %v607_v6, 0.0  ;;  %v609_v11 = vld [vmem:[%s2075_s3 + $0xe30] sm:$0xff]  ;;  %v610_v12 = vld [vmem:[%s2075_s3 + $0xe38] sm:$0xff]  ;;  %1626 = vst [vmem:[%s2090_s16 + $0xdf8] sm:$0xff] %v1114_v1  ;;  %v1120_v13 = vmax.f32 %v608_v10, 0.0 }
 0x128   : > { %1627 = vst [vmem:[%s2090_s16 + $0xe00] sm:$0xff] %v1115_v2  ;;  %1628 = vst [vmem:[%s2090_s16 + $0xe08] sm:$0xff] %v1116_v3  ;;  %v1121_v14 = vmax.f32 %v609_v11, 0.0  ;;  %v1122_v15 = vmax.f32 %v610_v12, 0.0  ;;  %v611_v16 = vld [vmem:[%s2075_s3 + $0xe40] sm:$0xff]  ;;  %v612_v17 = vld [vmem:[%s2075_s3 + $0xe48] sm:$0xff] }
 0x129   : > { %v613_v18 = vld [vmem:[%s2075_s3 + $0xe50] sm:$0xff]  ;;  %1629 = vst [vmem:[%s2090_s16 + $0xe10] sm:$0xff] %v1117_v7  ;;  %1630 = vst [vmem:[%s2090_s16 + $0xe18] sm:$0xff] %v1118_v8  ;;  %v1123_v19 = vmax.f32 %v611_v16, 0.0  ;;  %v1124_v20 = vmax.f32 %v612_v17, 0.0  ;;  %v614_v22 = vld [vmem:[%s2075_s3 + $0xe58] sm:$0xff] }
 0x12a   : > { %1631 = vst [vmem:[%s2090_s16 + $0xe20] sm:$0xff] %v1119_v9  ;;  %v1125_v21 = vmax.f32 %v613_v18, 0.0  ;;  %v615_v23 = vld [vmem:[%s2075_s3 + $0xe60] sm:$0xff]  ;;  %v616_v24 = vld [vmem:[%s2075_s3 + $0xe68] sm:$0xff]  ;;  %1632 = vst [vmem:[%s2090_s16 + $0xe28] sm:$0xff] %v1120_v13  ;;  %v1126_v25 = vmax.f32 %v614_v22, 0.0 }
 0x12b   : > { %1633 = vst [vmem:[%s2090_s16 + $0xe30] sm:$0xff] %v1121_v14  ;;  %1634 = vst [vmem:[%s2090_s16 + $0xe38] sm:$0xff] %v1122_v15  ;;  %v1127_v26 = vmax.f32 %v615_v23, 0.0  ;;  %v1128_v27 = vmax.f32 %v616_v24, 0.0  ;;  %v617_v28 = vld [vmem:[%s2075_s3 + $0xe70] sm:$0xff]  ;;  %v618_v29 = vld [vmem:[%s2075_s3 + $0xe78] sm:$0xff] }
 0x12c   : > { %v619_v30 = vld [vmem:[%s2075_s3 + $0xe80] sm:$0xff]  ;;  %1635 = vst [vmem:[%s2090_s16 + $0xe40] sm:$0xff] %v1123_v19  ;;  %1636 = vst [vmem:[%s2090_s16 + $0xe48] sm:$0xff] %v1124_v20  ;;  %v1129_v31 = vmax.f32 %v617_v28, 0.0  ;;  %v1130_v32 = vmax.f32 %v618_v29, 0.0  ;;  %v620_v34 = vld [vmem:[%s2075_s3 + $0xe88] sm:$0xff] }
 0x12d   : > { %1637 = vst [vmem:[%s2090_s16 + $0xe50] sm:$0xff] %v1125_v21  ;;  %v1131_v33 = vmax.f32 %v619_v30, 0.0  ;;  %v621_v35 = vld [vmem:[%s2075_s3 + $0xe90] sm:$0xff]  ;;  %v622_v36 = vld [vmem:[%s2075_s3 + $0xe98] sm:$0xff]  ;;  %1638 = vst [vmem:[%s2090_s16 + $0xe58] sm:$0xff] %v1126_v25  ;;  %v1132_v37 = vmax.f32 %v620_v34, 0.0 }
 0x12e   : > { %1639 = vst [vmem:[%s2090_s16 + $0xe60] sm:$0xff] %v1127_v26  ;;  %1640 = vst [vmem:[%s2090_s16 + $0xe68] sm:$0xff] %v1128_v27  ;;  %v1133_v38 = vmax.f32 %v621_v35, 0.0  ;;  %v1134_v39 = vmax.f32 %v622_v36, 0.0  ;;  %v623_v40 = vld [vmem:[%s2075_s3 + $0xea0] sm:$0xff]  ;;  %v624_v41 = vld [vmem:[%s2075_s3 + $0xea8] sm:$0xff] }
 0x12f   : > { %v625_v42 = vld [vmem:[%s2075_s3 + $0xeb0] sm:$0xff]  ;;  %1641 = vst [vmem:[%s2090_s16 + $0xe70] sm:$0xff] %v1129_v31  ;;  %1642 = vst [vmem:[%s2090_s16 + $0xe78] sm:$0xff] %v1130_v32  ;;  %v1135_v43 = vmax.f32 %v623_v40, 0.0  ;;  %v1136_v44 = vmax.f32 %v624_v41, 0.0  ;;  %v626_v46 = vld [vmem:[%s2075_s3 + $0xeb8] sm:$0xff] }
 0x130   : > { %1643 = vst [vmem:[%s2090_s16 + $0xe80] sm:$0xff] %v1131_v33  ;;  %v1137_v45 = vmax.f32 %v625_v42, 0.0  ;;  %v627_v47 = vld [vmem:[%s2075_s3 + $0xec0] sm:$0xff]  ;;  %v628_v48 = vld [vmem:[%s2075_s3 + $0xec8] sm:$0xff]  ;;  %1644 = vst [vmem:[%s2090_s16 + $0xe88] sm:$0xff] %v1132_v37  ;;  %v1138_v49 = vmax.f32 %v626_v46, 0.0 }
 0x131   : > { %1645 = vst [vmem:[%s2090_s16 + $0xe90] sm:$0xff] %v1133_v38  ;;  %1646 = vst [vmem:[%s2090_s16 + $0xe98] sm:$0xff] %v1134_v39  ;;  %v1139_v50 = vmax.f32 %v627_v47, 0.0  ;;  %v1140_v51 = vmax.f32 %v628_v48, 0.0  ;;  %v629_v52 = vld [vmem:[%s2075_s3 + $0xed0] sm:$0xff]  ;;  %v630_v53 = vld [vmem:[%s2075_s3 + $0xed8] sm:$0xff] }
 0x132   : > { %v631_v54 = vld [vmem:[%s2075_s3 + $0xee0] sm:$0xff]  ;;  %1647 = vst [vmem:[%s2090_s16 + $0xea0] sm:$0xff] %v1135_v43  ;;  %1648 = vst [vmem:[%s2090_s16 + $0xea8] sm:$0xff] %v1136_v44  ;;  %v1141_v55 = vmax.f32 %v629_v52, 0.0  ;;  %v1142_v56 = vmax.f32 %v630_v53, 0.0  ;;  %v632_v58 = vld [vmem:[%s2075_s3 + $0xee8] sm:$0xff] }
 0x133   : > { %1649 = vst [vmem:[%s2090_s16 + $0xeb0] sm:$0xff] %v1137_v45  ;;  %v1143_v57 = vmax.f32 %v631_v54, 0.0  ;;  %v633_v59 = vld [vmem:[%s2075_s3 + $0xef0] sm:$0xff]  ;;  %v634_v60 = vld [vmem:[%s2075_s3 + $0xef8] sm:$0xff]  ;;  %1650 = vst [vmem:[%s2090_s16 + $0xeb8] sm:$0xff] %v1138_v49  ;;  %v1144_v61 = vmax.f32 %v632_v58, 0.0 }
 0x134   : > { %1651 = vst [vmem:[%s2090_s16 + $0xec0] sm:$0xff] %v1139_v50  ;;  %1652 = vst [vmem:[%s2090_s16 + $0xec8] sm:$0xff] %v1140_v51  ;;  %v1145_v62 = vmax.f32 %v633_v59, 0.0  ;;  %v1146_v63 = vmax.f32 %v634_v60, 0.0  ;;  %v635_v0 = vld [vmem:[%s2075_s3 + $0xf00] sm:$0xff]  ;;  %v636_v1 = vld [vmem:[%s2075_s3 + $0xf08] sm:$0xff] }
 0x135   : > { %v637_v2 = vld [vmem:[%s2075_s3 + $0xf10] sm:$0xff]  ;;  %1653 = vst [vmem:[%s2090_s16 + $0xed0] sm:$0xff] %v1141_v55  ;;  %1654 = vst [vmem:[%s2090_s16 + $0xed8] sm:$0xff] %v1142_v56  ;;  %v1147_v3 = vmax.f32 %v635_v0, 0.0  ;;  %v1148_v4 = vmax.f32 %v636_v1, 0.0  ;;  %v638_v6 = vld [vmem:[%s2075_s3 + $0xf18] sm:$0xff] }
 0x136   : > { %1655 = vst [vmem:[%s2090_s16 + $0xee0] sm:$0xff] %v1143_v57  ;;  %v1149_v5 = vmax.f32 %v637_v2, 0.0  ;;  %v639_v7 = vld [vmem:[%s2075_s3 + $0xf20] sm:$0xff]  ;;  %v640_v8 = vld [vmem:[%s2075_s3 + $0xf28] sm:$0xff]  ;;  %1656 = vst [vmem:[%s2090_s16 + $0xee8] sm:$0xff] %v1144_v61  ;;  %v1150_v9 = vmax.f32 %v638_v6, 0.0 }
 0x137   : > { %1657 = vst [vmem:[%s2090_s16 + $0xef0] sm:$0xff] %v1145_v62  ;;  %1658 = vst [vmem:[%s2090_s16 + $0xef8] sm:$0xff] %v1146_v63  ;;  %v1151_v10 = vmax.f32 %v639_v7, 0.0  ;;  %v1152_v11 = vmax.f32 %v640_v8, 0.0  ;;  %v641_v12 = vld [vmem:[%s2075_s3 + $0xf30] sm:$0xff]  ;;  %v642_v13 = vld [vmem:[%s2075_s3 + $0xf38] sm:$0xff] }
 0x138   : > { %v643_v14 = vld [vmem:[%s2075_s3 + $0xf40] sm:$0xff]  ;;  %1659 = vst [vmem:[%s2090_s16 + $0xf00] sm:$0xff] %v1147_v3  ;;  %1660 = vst [vmem:[%s2090_s16 + $0xf08] sm:$0xff] %v1148_v4  ;;  %v1153_v15 = vmax.f32 %v641_v12, 0.0  ;;  %v1154_v16 = vmax.f32 %v642_v13, 0.0  ;;  %v644_v18 = vld [vmem:[%s2075_s3 + $0xf48] sm:$0xff] }
 0x139   : > { %1661 = vst [vmem:[%s2090_s16 + $0xf10] sm:$0xff] %v1149_v5  ;;  %v1155_v17 = vmax.f32 %v643_v14, 0.0  ;;  %v645_v19 = vld [vmem:[%s2075_s3 + $0xf50] sm:$0xff]  ;;  %v646_v20 = vld [vmem:[%s2075_s3 + $0xf58] sm:$0xff]  ;;  %1662 = vst [vmem:[%s2090_s16 + $0xf18] sm:$0xff] %v1150_v9  ;;  %v1156_v21 = vmax.f32 %v644_v18, 0.0 }
 0x13a   : > { %1663 = vst [vmem:[%s2090_s16 + $0xf20] sm:$0xff] %v1151_v10  ;;  %1664 = vst [vmem:[%s2090_s16 + $0xf28] sm:$0xff] %v1152_v11  ;;  %v1157_v22 = vmax.f32 %v645_v19, 0.0  ;;  %v1158_v23 = vmax.f32 %v646_v20, 0.0  ;;  %v647_v24 = vld [vmem:[%s2075_s3 + $0xf60] sm:$0xff]  ;;  %v648_v25 = vld [vmem:[%s2075_s3 + $0xf68] sm:$0xff] }
 0x13b   : > { %v649_v26 = vld [vmem:[%s2075_s3 + $0xf70] sm:$0xff]  ;;  %1665 = vst [vmem:[%s2090_s16 + $0xf30] sm:$0xff] %v1153_v15  ;;  %1666 = vst [vmem:[%s2090_s16 + $0xf38] sm:$0xff] %v1154_v16  ;;  %v1159_v27 = vmax.f32 %v647_v24, 0.0  ;;  %v1160_v28 = vmax.f32 %v648_v25, 0.0  ;;  %v650_v30 = vld [vmem:[%s2075_s3 + $0xf78] sm:$0xff] }
 0x13c   : > { %1667 = vst [vmem:[%s2090_s16 + $0xf40] sm:$0xff] %v1155_v17  ;;  %v1161_v29 = vmax.f32 %v649_v26, 0.0  ;;  %v651_v31 = vld [vmem:[%s2075_s3 + $0xf80] sm:$0xff]  ;;  %v652_v32 = vld [vmem:[%s2075_s3 + $0xf88] sm:$0xff]  ;;  %1668 = vst [vmem:[%s2090_s16 + $0xf48] sm:$0xff] %v1156_v21  ;;  %v1162_v33 = vmax.f32 %v650_v30, 0.0 }
 0x13d   : > { %1669 = vst [vmem:[%s2090_s16 + $0xf50] sm:$0xff] %v1157_v22  ;;  %1670 = vst [vmem:[%s2090_s16 + $0xf58] sm:$0xff] %v1158_v23  ;;  %v1163_v34 = vmax.f32 %v651_v31, 0.0  ;;  %v1164_v35 = vmax.f32 %v652_v32, 0.0  ;;  %v653_v36 = vld [vmem:[%s2075_s3 + $0xf90] sm:$0xff]  ;;  %v654_v37 = vld [vmem:[%s2075_s3 + $0xf98] sm:$0xff] }
 0x13e   : > { %v655_v38 = vld [vmem:[%s2075_s3 + $0xfa0] sm:$0xff]  ;;  %1671 = vst [vmem:[%s2090_s16 + $0xf60] sm:$0xff] %v1159_v27  ;;  %1672 = vst [vmem:[%s2090_s16 + $0xf68] sm:$0xff] %v1160_v28  ;;  %v1165_v39 = vmax.f32 %v653_v36, 0.0  ;;  %v1166_v40 = vmax.f32 %v654_v37, 0.0  ;;  %v656_v42 = vld [vmem:[%s2075_s3 + $0xfa8] sm:$0xff] }
 0x13f   : > { %1673 = vst [vmem:[%s2090_s16 + $0xf70] sm:$0xff] %v1161_v29  ;;  %v1167_v41 = vmax.f32 %v655_v38, 0.0  ;;  %v657_v43 = vld [vmem:[%s2075_s3 + $0xfb0] sm:$0xff]  ;;  %v658_v44 = vld [vmem:[%s2075_s3 + $0xfb8] sm:$0xff]  ;;  %1674 = vst [vmem:[%s2090_s16 + $0xf78] sm:$0xff] %v1162_v33  ;;  %v1168_v45 = vmax.f32 %v656_v42, 0.0 }
 0x140   : > { %1675 = vst [vmem:[%s2090_s16 + $0xf80] sm:$0xff] %v1163_v34  ;;  %1676 = vst [vmem:[%s2090_s16 + $0xf88] sm:$0xff] %v1164_v35  ;;  %v1169_v46 = vmax.f32 %v657_v43, 0.0  ;;  %v1170_v47 = vmax.f32 %v658_v44, 0.0  ;;  %v659_v48 = vld [vmem:[%s2075_s3 + $0xfc0] sm:$0xff]  ;;  %v660_v49 = vld [vmem:[%s2075_s3 + $0xfc8] sm:$0xff] }
 0x141   : > { %v661_v50 = vld [vmem:[%s2075_s3 + $0xfd0] sm:$0xff]  ;;  %1677 = vst [vmem:[%s2090_s16 + $0xf90] sm:$0xff] %v1165_v39  ;;  %1678 = vst [vmem:[%s2090_s16 + $0xf98] sm:$0xff] %v1166_v40  ;;  %v1171_v51 = vmax.f32 %v659_v48, 0.0  ;;  %v1172_v52 = vmax.f32 %v660_v49, 0.0  ;;  %v662_v54 = vld [vmem:[%s2075_s3 + $0xfd8] sm:$0xff] }
 0x142   : > { %1679 = vst [vmem:[%s2090_s16 + $0xfa0] sm:$0xff] %v1167_v41  ;;  %v1173_v53 = vmax.f32 %v661_v50, 0.0  ;;  %v663_v55 = vld [vmem:[%s2075_s3 + $0xfe0] sm:$0xff]  ;;  %v664_v56 = vld [vmem:[%s2075_s3 + $0xfe8] sm:$0xff]  ;;  %1680 = vst [vmem:[%s2090_s16 + $0xfa8] sm:$0xff] %v1168_v45  ;;  %v1174_v57 = vmax.f32 %v662_v54, 0.0 }
 0x143   : > { %1681 = vst [vmem:[%s2090_s16 + $0xfb0] sm:$0xff] %v1169_v46  ;;  %1682 = vst [vmem:[%s2090_s16 + $0xfb8] sm:$0xff] %v1170_v47  ;;  %v1175_v58 = vmax.f32 %v663_v55, 0.0  ;;  %v1176_v59 = vmax.f32 %v664_v56, 0.0  ;;  %v665_v60 = vld [vmem:[%s2075_s3 + $0xff0] sm:$0xff]  ;;  %v666_v61 = vld [vmem:[%s2075_s3 + $0xff8] sm:$0xff] }
 0x144   : > { %1683 = vst [vmem:[%s2090_s16 + $0xfc0] sm:$0xff] %v1171_v51  ;;  %1684 = vst [vmem:[%s2090_s16 + $0xfc8] sm:$0xff] %v1172_v52  ;;  %v1177_v62 = vmax.f32 %v665_v60, 0.0  ;;  %v1178_v63 = vmax.f32 %v666_v61, 0.0  ;;  %1698 = sbr.rel (!%p2017_p9) target bundleno = 359 (0x167), region = 32  ;;  %s1700_s30 = ssub.s32 (%p2017_p9), 18, %s1802_s25 }
 0x145   : > { %1685 = vst [vmem:[%s2090_s16 + $0xfd0] sm:$0xff] %v1173_v53  ;;  %1686 = vst [vmem:[%s2090_s16 + $0xfd8] sm:$0xff] %v1174_v57  ;;  %p1701_p6 = scmp.lt.s32.totalorder (%p2017_p9), %s1700_s30, 8 }
 0x146   : > { %1687 = vst [vmem:[%s2090_s16 + $0xfe0] sm:$0xff] %v1175_v58  ;;  %1688 = vst [vmem:[%s2090_s16 + $0xfe8] sm:$0xff] %v1176_v59 }
 0x147   : > { %1689 = vst [vmem:[%s2090_s16 + $0xff0] sm:$0xff] %v1177_v62  ;;  %1690 = vst [vmem:[%s2090_s16 + $0xff8] sm:$0xff] %v1178_v63 }
 0x14b   : > { %s3182_s30 = smov (!%p1701_p6, %s1700_s30), 8 }
 0x14c   : > { %s3111_s2 = sshll.u32 %s3182_s30, 13 }
 0x14d   : > { %s1706_s4 = ssub.s32 65536, %s3111_s2 }
 0x14e   : > { %1707 = vsyncadd %s1692_s23, %s1706_s4  ;;  %p1805_p10 = scmp.ne.s32.totalorder %s3111_s2, 0  ;;  %s1817_s17 = sshll.u32 %s1994_s10, 16 }
 0x14f   : > { %s3121_s13 = scalar_lea.hbm %s3170_s1, %s1817_s17  ;;  %s1713_s14 = sshll.u32 %s2090_s16, 4  ;;  %s3124_s14 = int_to_ptr.vmem [resolvable:$true] %s1713_s14 }
 0x150   : > { %s1889_s19 = scalar_lea.vmem %s3124_s14, %s3111_s2  ;;  %s1960_s20 = smov [#allocation5]  }
 0x151   : > { %p1890_p9 = scmp.ne.s32.totalorder %s3124_s14, %s1889_s19  ;;  %s1893_s21 = sshll.u32 %s1960_s20, 4  ;;  %s1894_s21 = int_to_ptr.vmem [resolvable:$false] %s1893_s21 }
 0x152   : > { %s1895_s10 = scalar_lea.vmem %s1894_s21, 131072  ;;  %p1896_p12 = scmp.lt.s32.totalorder %s3124_s14, %s1894_s21 }
 0x153   : > { %p1891_p13 = pnand %p1890_p9, %p1805_p10  ;;  %p1897_p0 = scmp.lt.s32.totalorder %s1895_s10, %s1889_s19 }
 0x155   : > { %p1892_p11 = pneg %p1891_p13  ;;  %p1898_p1 = por %p1897_p0, %p1896_p12 }
 0x157   : > { %p1899_p3 = pnand %p1898_p1, %p1892_p11 }
 0x159   : > { %1902 = shalt.err (!%p1899_p3)
}
 0x15a   : > { %s1903_s22 = scalar_lea.hbm %s3121_s13, %s3111_s2  ;;  %s1907_s28 = scalar_lea.hbm %s3170_s1, 147456 }
 0x15b   : > { %p1904_p4 = scmp.ne.s32.totalorder %s3121_s13, %s1903_s22  ;;  %p1908_p7 = scmp.lt.u32.totalorder %s3121_s13, %s3170_s1 }
 0x15c   : > { %p1909_p8 = scmp.lt.u32.totalorder %s1907_s28, %s1903_s22  ;;  %p1911_p9 = scmp.lt.u32.totalorder %s1903_s22, %s3121_s13 }
 0x15d   : > { %p1905_p5 = pnand %p1904_p4, %p1805_p10 }
 0x15e   : > { %p1910_p6 = por %p1909_p8, %p1908_p7 }
 0x15f   : > { %p1906_p2 = pneg %p1905_p5 }
 0x160   : > { %p1912_p13 = por %p1911_p9, %p1910_p6 }
 0x162   : > { %p1913_p11 = pnand %p1912_p13, %p1906_p2 }
 0x164   : > { %1916 = shalt.err (!%p1913_p11)
}
 0x165   : > { %s1961_s16 = smov 8192   ;;  %s1962_s25 = smov 512  }
 0x166   : > { %1719 = dma.vmem_to_hbm [thread:$0]  (%p1805_p10), %s3124_s14, %s3111_s2, %s3121_s13, %s1692_s23, %s1961_s16, %s1961_s16, %s1962_s25  }
 0x167 PF: > { %p1824_p12 = scmp.ge.s32.totalorder %s1955_s9, 2  ;;  %s1728_s30 = sand.u32 1, %s1943_s6  }
 0x168   : > { %p3174_p0 = scmp.ne.s32.totalorder %s3173_s18, 0  ;;  %s1729_s4 = scalar_lea.sflag [#allocation4], %s1728_s30 }
 0x16a   : > { %p1821_p1 = pnand %p1824_p12, %p3174_p0 }
 0x16c   : > { %1938 = dma.done.wait (!%p1821_p1), %s1729_s4, 65536  }
 0x16d   : > { %1940 = vsyncadd (!%p1821_p1), %s1729_s4, 4294901760  ;;  %p14_p3 = scmp.ge.s32.totalorder %s1998_s12, 5   ;;  %s3175_s6 = smov %s1947_s7 }
 0x16e   : > { %s3176_s7 = smov %s1951_s8  ;;  %s3177_s8 = smov %s2010_s15 }
 0x16f   : > { %s3178_s9 = smov %s1998_s12  ;;  %16 = sbr.rel (!%p14_p3) target bundleno = 5 (0x5), region = 69 }
 0x176   :  { %1734 = vsyncpa [#allocation3], 1 }
 0x177   :  { %1736 = vsyncpa [#allocation3 + $0x1], 1 }
 0x178   :  { %1737 = vsyncpa [#allocation4], 1 }
 0x179   :  { %1739 = vsyncpa [#allocation4 + $0x1], 1 }

</bundles_post_ra>
